<compile_context>
chip_gen: v5e
topology: v5e:2x2
jax: 0.10.0
libtpu: 0.0.40
codegen_flags: <defaults>
</compile_context>

<pallas_src>
import functools

import jax
import jax.numpy as jnp
from jax.experimental import pallas as pl
from jax.experimental.pallas import tpu as pltpu

LANE = 128
VMEM_LIMIT_BYTES = 32 * 1024 * 1024  # above v5e's 16 MiB default; safe on v6e/v7x


def _round_up(x, m):
    return (x + m - 1) // m * m


# ----------------------------------------------------------------------------
# Pallas kernels
# ----------------------------------------------------------------------------
def _make_rowwise_kernel(n_layers, acts):
    """Row-wise chain: val = act_i(val @ W_i + b_i); no cross-node mixing."""
    def kernel(*refs):
        x_ref = refs[0]
        layer_refs = refs[1:1 + 2 * n_layers]
        o_ref = refs[1 + 2 * n_layers]
        val = x_ref[...]
        for i in range(n_layers):
            w_ref = layer_refs[2 * i]
            b_ref = layer_refs[2 * i + 1]
            y = jnp.dot(val.astype(jnp.bfloat16), w_ref[...],
                        preferred_element_type=jnp.float32)
            y = y + b_ref[...]
            if acts[i] == "relu":
                y = jnp.maximum(y, 0.0)
            elif acts[i] == "sigmoid":
                y = jax.nn.sigmoid(y)
            val = y
        o_ref[...] = val.astype(o_ref.dtype)
    return kernel


def _make_conv_kernel(n_post, post_acts):
    """acc(=bias at k==0) += A_blk @ H_blk over k; at k==last: relu then fused epilogue."""
    def kernel(*refs):
        a_ref, h_ref, bconv_ref = refs[0], refs[1], refs[2]
        post_refs = refs[3:3 + 2 * n_post]
        o_ref = refs[3 + 2 * n_post]
        acc_ref = refs[4 + 2 * n_post]

        @pl.when(pl.program_id(1) == 0)
        def _init():
            # Seed the accumulator with the (broadcast) conv bias so finalize is
            # just relu + epilogue (saves one full-tile VALU add on the hot path).
            acc_ref[...] = jnp.broadcast_to(bconv_ref[...], acc_ref.shape)

        acc_ref[...] += jnp.dot(a_ref[...], h_ref[...],
                                preferred_element_type=jnp.float32)

        @pl.when(pl.program_id(1) == pl.num_programs(1) - 1)
        def _finalize():
            val = jnp.maximum(acc_ref[...], 0.0)  # relu(A@H + b)
            for i in range(n_post):
                w_ref = post_refs[2 * i]
                b_ref = post_refs[2 * i + 1]
                y = jnp.dot(val.astype(jnp.bfloat16), w_ref[...],
                            preferred_element_type=jnp.float32)
                y = y + b_ref[...]
                if post_acts[i] == "relu":
                    y = jnp.maximum(y, 0.0)
                elif post_acts[i] == "sigmoid":
                    y = jax.nn.sigmoid(y)
                val = y
            o_ref[...] = val.astype(o_ref.dtype)
    return kernel


# ----------------------------------------------------------------------------
# pallas_call wrappers
# ----------------------------------------------------------------------------
def rowwise_chain(x, layers, out_dtype, tm):
    """layers: list of (W [Fin_pad,Fout_pad] bf16, b [1,Fout_pad] f32, activation)."""
    n, fin = x.shape
    fout = layers[-1][0].shape[1]
    acts = tuple(act for (_, _, act) in layers)
    in_specs = [pl.BlockSpec((tm, fin), lambda i: (i, 0))]
    args = [x]
    for (w, b, _) in layers:
        in_specs.append(pl.BlockSpec(w.shape, lambda i: (0, 0)))
        in_specs.append(pl.BlockSpec(b.shape, lambda i: (0, 0)))
        args.extend((w, b))

    flops = sum(2 * n * w.shape[0] * w.shape[1] for (w, _, _) in layers)
    bytes_accessed = (
        x.size * x.dtype.itemsize
        + n * fout * jnp.dtype(out_dtype).itemsize
        + sum(w.size * w.dtype.itemsize + b.size * b.dtype.itemsize
              for (w, b, _) in layers))

    return pl.pallas_call(
        _make_rowwise_kernel(len(layers), acts),
        out_shape=jax.ShapeDtypeStruct((n, fout), out_dtype),
        grid=(n // tm,),
        in_specs=in_specs,
        out_specs=pl.BlockSpec((tm, fout), lambda i: (i, 0)),
        compiler_params=pltpu.CompilerParams(
            dimension_semantics=("parallel",),
            vmem_limit_bytes=VMEM_LIMIT_BYTES),
        cost_estimate=pl.CostEstimate(flops=flops, transcendentals=0,
                                      bytes_accessed=bytes_accessed),
    )(*args)


def gcn_conv_fused(a, h, b_conv, post_layers, out_dtype, tm, tk):
    """relu(A @ H + b_conv) followed by a fused per-row epilogue chain (post_layers)."""
    n = a.shape[0]
    f = h.shape[1]
    fout = post_layers[-1][0].shape[1] if post_layers else f
    acts = tuple(act for (_, _, act) in post_layers)

    in_specs = [
        pl.BlockSpec((tm, tk), lambda i, k: (i, k)),   # A tile
        pl.BlockSpec((tk, f), lambda i, k: (k, 0)),    # H k-slab
        pl.BlockSpec((1, f), lambda i, k: (0, 0)),     # conv bias, constant across k
    ]
    args = [a, h, b_conv]
    for (w, bb, _) in post_layers:
        in_specs.append(pl.BlockSpec(w.shape, lambda i, k: (0, 0)))
        in_specs.append(pl.BlockSpec(bb.shape, lambda i, k: (0, 0)))
        args.extend((w, bb))

    flops = 2 * n * n * f + sum(2 * n * w.shape[0] * w.shape[1]
                                for (w, _, _) in post_layers)
    transcendentals = n * fout if any(act == "sigmoid" for act in acts) else 0
    bytes_accessed = (
        a.size * a.dtype.itemsize + h.size * h.dtype.itemsize
        + n * fout * jnp.dtype(out_dtype).itemsize
        + sum(w.size * w.dtype.itemsize + bb.size * bb.dtype.itemsize
              for (w, bb, _) in post_layers))

    return pl.pallas_call(
        _make_conv_kernel(len(post_layers), acts),
        out_shape=jax.ShapeDtypeStruct((n, fout), out_dtype),
        grid=(n // tm, n // tk),
        in_specs=in_specs,
        out_specs=pl.BlockSpec((tm, fout), lambda i, k: (i, 0)),
        scratch_shapes=[pltpu.VMEM((tm, f), jnp.float32)],
        compiler_params=pltpu.CompilerParams(
            dimension_semantics=("parallel", "arbitrary"),
            vmem_limit_bytes=VMEM_LIMIT_BYTES),
        cost_estimate=pl.CostEstimate(flops=flops,
                                      transcendentals=transcendentals,
                                      bytes_accessed=bytes_accessed),
    )(*args)


# ----------------------------------------------------------------------------
# Forward pass (mirrors GCN.forward with dropout=identity, bn=None)
# ----------------------------------------------------------------------------
def gcn_forward_padded(padded_params, a_pad, x_pad, *, tm, tk):
    convs = padded_params["convs"]
    mlp = padded_params["mlp"]
    h_width = convs[0][0].shape[1]
    zero_b = jnp.zeros((1, h_width), jnp.float32)

    # H0 = X @ Wc0  (first conv's feature transform, computed once)
    h = rowwise_chain(x_pad, [(convs[0][0], zero_b, "none")], jnp.bfloat16, tm)

    n_convs = len(convs)
    out = None
    for l in range(n_convs):
        b_conv = convs[l][1]
        if l < n_convs - 1:
            # relu(A@H + b) fused with the NEXT conv's feature transform
            post = [(convs[l + 1][0], zero_b, "none")]
            h = gcn_conv_fused(a_pad, h, b_conv, post, jnp.bfloat16, tm, tk)
        else:
            # relu(A@H + b) fused with the entire MLP classifier
            post = [(w, b, "relu") for (w, b) in mlp[:-1]]
            post.append((mlp[-1][0], mlp[-1][1], "sigmoid"))
            out = gcn_conv_fused(a_pad, h, b_conv, post, jnp.float32, tm, tk)
    return out


# ----------------------------------------------------------------------------
# Glue: normalized adjacency, params, padding (plain JAX)
# ----------------------------------------------------------------------------
def build_normalized_adjacency(edge_index, num_nodes):
    """Dense D^{-1/2}(A + I)D^{-1/2}; scatter-ADD so duplicate edges accumulate."""
    src = edge_index[0]
    dst = edge_index[1]
    a = jnp.zeros((num_nodes, num_nodes), dtype=jnp.float32)
    a = a.at[dst, src].add(1.0)                       # message j -> i into row i
    a = a + jnp.eye(num_nodes, dtype=jnp.float32)     # self loops
    deg = jnp.sum(a, axis=1)
    d_inv_sqrt = jnp.where(deg > 0, jax.lax.rsqrt(deg), 0.0)
    return d_inv_sqrt[:, None] * a * d_inv_sqrt[None, :]


def xavier_uniform(key, fan_in, fan_out):
    # torch xavier_uniform_ on a [fan_out, fan_in] weight, returned as [fan_in, fan_out].
    limit = jnp.sqrt(6.0 / (fan_in + fan_out))
    w = jax.random.uniform(key, (fan_out, fan_in), jnp.float32, -limit, limit)
    return w.T


def init_gcn_params(key, input_dim, hidden_dim, output_dim, num_layers, gcn_layers):
    params = {"convs": [], "mlp": []}
    keys = jax.random.split(key, gcn_layers + num_layers + 1)
    for i in range(gcn_layers):
        fin = input_dim if i == 0 else hidden_dim
        params["convs"].append((xavier_uniform(keys[i], fin, hidden_dim),
                                jnp.zeros((1, hidden_dim), jnp.float32)))
    for i in range(num_layers):
        params["mlp"].append((xavier_uniform(keys[gcn_layers + i], hidden_dim, hidden_dim),
                              jnp.zeros((1, hidden_dim), jnp.float32)))
    params["mlp"].append((xavier_uniform(keys[-1], hidden_dim, output_dim),
                          jnp.zeros((1, output_dim), jnp.float32)))
    return params


def _pad_weight(w, rows, cols):
    out = jnp.zeros((rows, cols), jnp.float32)
    return out.at[:w.shape[0], :w.shape[1]].set(w).astype(jnp.bfloat16)


def _pad_bias(b, cols):
    out = jnp.zeros((1, cols), jnp.float32)
    return out.at[:, :b.shape[1]].set(b)


def pad_params(params, fin_pad, h_pad, out_pad):
    convs = []
    for i, (w, b) in enumerate(params["convs"]):
        rows = fin_pad if i == 0 else h_pad
        convs.append((_pad_weight(w, rows, h_pad), _pad_bias(b, h_pad)))
    mlp = []
    n_mlp = len(params["mlp"])
    for i, (w, b) in enumerate(params["mlp"]):
        cols = h_pad if i < n_mlp - 1 else out_pad
        mlp.append((_pad_weight(w, h_pad, cols), _pad_bias(b, cols)))
    return {"convs": convs, "mlp": mlp}


def reference_forward(params, a_norm, x):
    """Plain-JAX f32 reference of the same forward semantics."""
    convs, mlp = params["convs"], params["mlp"]
    h = x @ convs[0][0]
    for l, (_, b) in enumerate(convs):
        h = jnp.maximum(a_norm @ h + b, 0.0)
        if l < len(convs) - 1:
            h = h @ convs[l + 1][0]
    for (w, b) in mlp[:-1]:
        h = jnp.maximum(h @ w + b, 0.0)
    w, b = mlp[-1]
    return jax.nn.sigmoid(h @ w + b)


# ----------------------------------------------------------------------------
# Demo
# ----------------------------------------------------------------------------
if __name__ == "__main__":
    N = 64            # graph nodes
    E = 256           # edges
    INPUT_DIM = 16
    HIDDEN_DIM = 32
    OUTPUT_DIM = 1
    NUM_LAYERS = 2    # MLP hidden layers
    GCN_LAYERS = 2

    key = jax.random.PRNGKey(0)
    k_x, k_e, k_p = jax.random.split(key, 3)
    x = jax.random.normal(k_x, (N, INPUT_DIM), dtype=jnp.float32)
    edge_index = jax.random.randint(k_e, (2, E), 0, N, dtype=jnp.int32)
    params = init_gcn_params(k_p, INPUT_DIM, HIDDEN_DIM, OUTPUT_DIM,
                             NUM_LAYERS, GCN_LAYERS)

    # Tiling: 128 row/K tiles for this toy N; use 256-512 at large N (fits 64 MiB VMEM on v7x).
    tile = 128 if N <= 256 else 512
    n_pad = _round_up(N, tile)
    fin_pad = _round_up(INPUT_DIM, LANE)
    h_pad = _round_up(HIDDEN_DIM, LANE)
    out_pad = _round_up(OUTPUT_DIM, LANE)

    # Build + pad the normalized adjacency ONCE (hoisted out of the forward), bf16.
    a_norm = build_normalized_adjacency(edge_index, N)
    a_pad = jnp.zeros((n_pad, n_pad), jnp.bfloat16).at[:N, :N].set(a_norm.astype(jnp.bfloat16))
    x_pad = jnp.zeros((n_pad, fin_pad), jnp.bfloat16).at[:N, :INPUT_DIM].set(x.astype(jnp.bfloat16))
    padded_params = pad_params(params, fin_pad, h_pad, out_pad)

    forward = jax.jit(functools.partial(gcn_forward_padded, tm=tile, tk=tile))
    out_slab = jax.block_until_ready(forward(padded_params, a_pad, x_pad))
    out = out_slab[:N, :OUTPUT_DIM]

    ref = reference_forward(params, a_norm, x)
    assert out.shape == (N, OUTPUT_DIM)
    assert bool(jnp.all(jnp.isfinite(out)))
    assert bool(jnp.all((out >= 0.0) & (out <= 1.0)))          # sigmoid range
    assert bool(jnp.max(jnp.abs(out - ref)) < 0.05)            # bf16-matmul tolerance
    print("KERNEL_OK")
</pallas_src>

<mosaic_0001>
module attributes {stable_mosaic.version = 11 : i64} {
  func.func @kernel(%arg0: i32, %arg1: memref<128x128xbf16, #tpu.memory_space<vmem>>, %arg2: memref<128x128xbf16, #tpu.memory_space<vmem>>, %arg3: memref<1x128xf32, #tpu.memory_space<vmem>>, %arg4: memref<128x128xbf16, #tpu.memory_space<vmem>>) attributes {dimension_semantics = [#tpu.dimension_semantics<parallel>], iteration_bounds = array<i64: 1>, scalar_prefetch = 0 : i64, scratch_operands = 0 : i64, tpu.core_type = #tpu.core_type<tc>, window_params = [{transform_indices = @transform_0, window_bounds = array<i64: 128, 128>}, {pipeline_mode = #tpu.pipeline_mode<synchronous>, transform_indices = @transform_1, window_bounds = array<i64: 128, 128>}, {pipeline_mode = #tpu.pipeline_mode<synchronous>, transform_indices = @transform_2, window_bounds = array<i64: 1, 128>}, {transform_indices = @transform_3, window_bounds = array<i64: 128, 128>}]} {
    %c0 = arith.constant 0 : index
    %c0_0 = arith.constant 0 : index
    %0 = vector.load %arg1[%c0, %c0_0] : memref<128x128xbf16, #tpu.memory_space<vmem>>, vector<128x128xbf16>
    %c0_1 = arith.constant 0 : index
    %c0_2 = arith.constant 0 : index
    %1 = vector.load %arg2[%c0_1, %c0_2] : memref<128x128xbf16, #tpu.memory_space<vmem>>, vector<128x128xbf16>
    %cst = arith.constant dense<0.000000e+00> : vector<128x128xf32>
    %2 = tpu.matmul %0, %1, %cst {dimension_numbers = #tpu.dot_dimension_numbers<[1], [0], [0], [1], [0, 0, 1, 1], [], []>} : vector<128x128xbf16>, vector<128x128xbf16>, vector<128x128xf32> -> vector<128x128xf32>
    %c0_3 = arith.constant 0 : index
    %c0_4 = arith.constant 0 : index
    %3 = vector.load %arg3[%c0_3, %c0_4] : memref<1x128xf32, #tpu.memory_space<vmem>>, vector<1x128xf32>
    %4 = vector.broadcast %3 : vector<1x128xf32> to vector<128x128xf32>
    %5 = arith.addf %2, %4 : vector<128x128xf32>
    %6 = arith.truncf %5 : vector<128x128xf32> to vector<128x128xbf16>
    %c0_5 = arith.constant 0 : index
    %c0_6 = arith.constant 0 : index
    %7 = vector.load %arg4[%c0_5, %c0_6] : memref<128x128xbf16, #tpu.memory_space<vmem>>, vector<128x128xbf16>
    tpu.vector_store %arg4[%c0_5, %c0_6], %6 {strides = array<i32>} : memref<128x128xbf16, #tpu.memory_space<vmem>>, vector<128x128xbf16>,
    return
  }
  func.func @transform_0(%arg0: i32) -> (i32, i32) {
    %c0_i32 = arith.constant 0 : i32
    %c0_i32_0 = arith.constant 0 : i32
    return %arg0, %c0_i32 : i32, i32
  }
  func.func @transform_1(%arg0: i32) -> (i32, i32) {
    %c0_i32 = arith.constant 0 : i32
    %c0_i32_0 = arith.constant 0 : i32
    %c0_i32_1 = arith.constant 0 : i32
    return %c0_i32, %c0_i32_0 : i32, i32
  }
  func.func @transform_2(%arg0: i32) -> (i32, i32) {
    %c0_i32 = arith.constant 0 : i32
    %c0_i32_0 = arith.constant 0 : i32
    %c0_i32_1 = arith.constant 0 : i32
    return %c0_i32, %c0_i32_0 : i32, i32
  }
  func.func @transform_3(%arg0: i32) -> (i32, i32) {
    %c0_i32 = arith.constant 0 : i32
    %c0_i32_0 = arith.constant 0 : i32
    return %arg0, %c0_i32 : i32, i32
  }
}

module attributes {stable_mosaic.version = 11 : i64} {
  func.func @kernel(%arg0: i32, %arg1: i32, %arg2: memref<128x128xbf16, #tpu.memory_space<vmem>>, %arg3: memref<128x128xbf16, #tpu.memory_space<vmem>>, %arg4: memref<1x128xf32, #tpu.memory_space<vmem>>, %arg5: memref<128x128xbf16, #tpu.memory_space<vmem>>, %arg6: memref<1x128xf32, #tpu.memory_space<vmem>>, %arg7: memref<128x128xbf16, #tpu.memory_space<vmem>>, %arg8: memref<128x128xf32, #tpu.memory_space<vmem>>) attributes {dimension_semantics = [#tpu.dimension_semantics<parallel>, #tpu.dimension_semantics<arbitrary>], iteration_bounds = array<i64: 1, 1>, scalar_prefetch = 0 : i64, scratch_operands = 1 : i64, tpu.core_type = #tpu.core_type<tc>, window_params = [{transform_indices = @transform_0, window_bounds = array<i64: 128, 128>}, {transform_indices = @transform_1, window_bounds = array<i64: 128, 128>}, {pipeline_mode = #tpu.pipeline_mode<synchronous>, transform_indices = @transform_2, window_bounds = array<i64: 1, 128>}, {pipeline_mode = #tpu.pipeline_mode<synchronous>, transform_indices = @transform_3, window_bounds = array<i64: 128, 128>}, {pipeline_mode = #tpu.pipeline_mode<synchronous>, transform_indices = @transform_4, window_bounds = array<i64: 1, 128>}, {transform_indices = @transform_5, window_bounds = array<i64: 128, 128>}]} {
    %c0_i32 = arith.constant 0 : i32
    %0 = arith.cmpi eq, %arg1, %c0_i32 : i32
    %1 = arith.extui %0 : i1 to i32
    %c0_i32_0 = arith.constant 0 : i32
    %2 = arith.cmpi ne, %1, %c0_i32_0 : i32
    scf.if %2 {
      %c0_10 = arith.constant 0 : index
      %c0_11 = arith.constant 0 : index
      %12 = vector.load %arg4[%c0_10, %c0_11] : memref<1x128xf32, #tpu.memory_space<vmem>>, vector<1x128xf32>
      %13 = vector.shape_cast %12 : vector<1x128xf32> to vector<1x128xf32>
      %14 = vector.broadcast %13 : vector<1x128xf32> to vector<128x128xf32>
      %c0_12 = arith.constant 0 : index
      %c0_13 = arith.constant 0 : index
      %15 = vector.load %arg8[%c0_12, %c0_13] : memref<128x128xf32, #tpu.memory_space<vmem>>, vector<128x128xf32>
      tpu.vector_store %arg8[%c0_12, %c0_13], %14 {strides = array<i32>} : memref<128x128xf32, #tpu.memory_space<vmem>>, vector<128x128xf32>,
    } else {
    }
    %c0 = arith.constant 0 : index
    %c0_1 = arith.constant 0 : index
    %3 = vector.load %arg8[%c0, %c0_1] : memref<128x128xf32, #tpu.memory_space<vmem>>, vector<128x128xf32>
    %c0_2 = arith.constant 0 : index
    %c0_3 = arith.constant 0 : index
    %4 = vector.load %arg2[%c0_2, %c0_3] : memref<128x128xbf16, #tpu.memory_space<vmem>>, vector<128x128xbf16>
    %c0_4 = arith.constant 0 : index
    %c0_5 = arith.constant 0 : index
    %5 = vector.load %arg3[%c0_4, %c0_5] : memref<128x128xbf16, #tpu.memory_space<vmem>>, vector<128x128xbf16>
    %cst = arith.constant dense<0.000000e+00> : vector<128x128xf32>
    %6 = tpu.matmul %4, %5, %cst {dimension_numbers = #tpu.dot_dimension_numbers<[1], [0], [0], [1], [0, 0, 1, 1], [], []>} : vector<128x128xbf16>, vector<128x128xbf16>, vector<128x128xf32> -> vector<128x128xf32>
    %7 = arith.addf %3, %6 : vector<128x128xf32>
    %c0_6 = arith.constant 0 : index
    %c0_7 = arith.constant 0 : index
    %8 = vector.load %arg8[%c0_6, %c0_7] : memref<128x128xf32, #tpu.memory_space<vmem>>, vector<128x128xf32>
    tpu.vector_store %arg8[%c0_6, %c0_7], %7 {strides = array<i32>} : memref<128x128xf32, #tpu.memory_space<vmem>>, vector<128x128xf32>,
    %c0_i32_8 = arith.constant 0 : i32
    %9 = arith.cmpi eq, %arg1, %c0_i32_8 : i32
    %10 = arith.extui %9 : i1 to i32
    %c0_i32_9 = arith.constant 0 : i32
    %11 = arith.cmpi ne, %10, %c0_i32_9 : i32
    scf.if %11 {
      %c0_10 = arith.constant 0 : index
      %c0_11 = arith.constant 0 : index
      %12 = vector.load %arg8[%c0_10, %c0_11] : memref<128x128xf32, #tpu.memory_space<vmem>>, vector<128x128xf32>
      %cst_12 = arith.constant 0.000000e+00 : f32
      %13 = vector.broadcast %cst_12 : f32 to vector<128x128xf32>
      %14 = arith.maximumf %12, %13 : vector<128x128xf32>
      %15 = arith.truncf %14 : vector<128x128xf32> to vector<128x128xbf16>
      %c0_13 = arith.constant 0 : index
      %c0_14 = arith.constant 0 : index
      %16 = vector.load %arg5[%c0_13, %c0_14] : memref<128x128xbf16, #tpu.memory_space<vmem>>, vector<128x128xbf16>
      %cst_15 = arith.constant dense<0.000000e+00> : vector<128x128xf32>
      %17 = tpu.matmul %15, %16, %cst_15 {dimension_numbers = #tpu.dot_dimension_numbers<[1], [0], [0], [1], [0, 0, 1, 1], [], []>} : vector<128x128xbf16>, vector<128x128xbf16>, vector<128x128xf32> -> vector<128x128xf32>
      %c0_16 = arith.constant 0 : index
      %c0_17 = arith.constant 0 : index
      %18 = vector.load %arg6[%c0_16, %c0_17] : memref<1x128xf32, #tpu.memory_space<vmem>>, vector<1x128xf32>
      %19 = vector.broadcast %18 : vector<1x128xf32> to vector<128x128xf32>
      %20 = arith.addf %17, %19 : vector<128x128xf32>
      %21 = arith.truncf %20 : vector<128x128xf32> to vector<128x128xbf16>
      %c0_18 = arith.constant 0 : index
      %c0_19 = arith.constant 0 : index
      %22 = vector.load %arg7[%c0_18, %c0_19] : memref<128x128xbf16, #tpu.memory_space<vmem>>, vector<128x128xbf16>
      tpu.vector_store %arg7[%c0_18, %c0_19], %21 {strides = array<i32>} : memref<128x128xbf16, #tpu.memory_space<vmem>>, vector<128x128xbf16>,
    } else {
    }
    return
  }
  func.func @transform_0(%arg0: i32, %arg1: i32) -> (i32, i32) {
    %c0_i32 = arith.constant 0 : i32
    return %arg0, %arg1 : i32, i32
  }
  func.func @transform_1(%arg0: i32, %arg1: i32) -> (i32, i32) {
    %c0_i32 = arith.constant 0 : i32
    %c0_i32_0 = arith.constant 0 : i32
    return %arg1, %c0_i32 : i32, i32
  }
  func.func @transform_2(%arg0: i32, %arg1: i32) -> (i32, i32) {
    %c0_i32 = arith.constant 0 : i32
    %c0_i32_0 = arith.constant 0 : i32
    %c0_i32_1 = arith.constant 0 : i32
    return %c0_i32, %c0_i32_0 : i32, i32
  }
  func.func @transform_3(%arg0: i32, %arg1: i32) -> (i32, i32) {
    %c0_i32 = arith.constant 0 : i32
    %c0_i32_0 = arith.constant 0 : i32
    %c0_i32_1 = arith.constant 0 : i32
    return %c0_i32, %c0_i32_0 : i32, i32
  }
  func.func @transform_4(%arg0: i32, %arg1: i32) -> (i32, i32) {
    %c0_i32 = arith.constant 0 : i32
    %c0_i32_0 = arith.constant 0 : i32
    %c0_i32_1 = arith.constant 0 : i32
    return %c0_i32, %c0_i32_0 : i32, i32
  }
  func.func @transform_5(%arg0: i32, %arg1: i32) -> (i32, i32) {
    %c0_i32 = arith.constant 0 : i32
    %c0_i32_0 = arith.constant 0 : i32
    return %arg0, %c0_i32 : i32, i32
  }
}

module attributes {stable_mosaic.version = 11 : i64} {
  func.func @kernel(%arg0: i32, %arg1: i32, %arg2: memref<128x128xbf16, #tpu.memory_space<vmem>>, %arg3: memref<128x128xbf16, #tpu.memory_space<vmem>>, %arg4: memref<1x128xf32, #tpu.memory_space<vmem>>, %arg5: memref<128x128xbf16, #tpu.memory_space<vmem>>, %arg6: memref<1x128xf32, #tpu.memory_space<vmem>>, %arg7: memref<128x128xbf16, #tpu.memory_space<vmem>>, %arg8: memref<1x128xf32, #tpu.memory_space<vmem>>, %arg9: memref<128x128xbf16, #tpu.memory_space<vmem>>, %arg10: memref<1x128xf32, #tpu.memory_space<vmem>>, %arg11: memref<128x128xf32, #tpu.memory_space<vmem>>, %arg12: memref<128x128xf32, #tpu.memory_space<vmem>>) attributes {dimension_semantics = [#tpu.dimension_semantics<parallel>, #tpu.dimension_semantics<arbitrary>], iteration_bounds = array<i64: 1, 1>, scalar_prefetch = 0 : i64, scratch_operands = 1 : i64, tpu.core_type = #tpu.core_type<tc>, window_params = [{transform_indices = @transform_0, window_bounds = array<i64: 128, 128>}, {transform_indices = @transform_1, window_bounds = array<i64: 128, 128>}, {pipeline_mode = #tpu.pipeline_mode<synchronous>, transform_indices = @transform_2, window_bounds = array<i64: 1, 128>}, {pipeline_mode = #tpu.pipeline_mode<synchronous>, transform_indices = @transform_3, window_bounds = array<i64: 128, 128>}, {pipeline_mode = #tpu.pipeline_mode<synchronous>, transform_indices = @transform_4, window_bounds = array<i64: 1, 128>}, {pipeline_mode = #tpu.pipeline_mode<synchronous>, transform_indices = @transform_5, window_bounds = array<i64: 128, 128>}, {pipeline_mode = #tpu.pipeline_mode<synchronous>, transform_indices = @transform_6, window_bounds = array<i64: 1, 128>}, {pipeline_mode = #tpu.pipeline_mode<synchronous>, transform_indices = @transform_7, window_bounds = array<i64: 128, 128>}, {pipeline_mode = #tpu.pipeline_mode<synchronous>, transform_indices = @transform_8, window_bounds = array<i64: 1, 128>}, {transform_indices = @transform_9, window_bounds = array<i64: 128, 128>}]} {
    %c0_i32 = arith.constant 0 : i32
    %0 = arith.cmpi eq, %arg1, %c0_i32 : i32
    %1 = arith.extui %0 : i1 to i32
    %c0_i32_0 = arith.constant 0 : i32
    %2 = arith.cmpi ne, %1, %c0_i32_0 : i32
    scf.if %2 {
      %c0_10 = arith.constant 0 : index
      %c0_11 = arith.constant 0 : index
      %12 = vector.load %arg4[%c0_10, %c0_11] : memref<1x128xf32, #tpu.memory_space<vmem>>, vector<1x128xf32>
      %13 = vector.shape_cast %12 : vector<1x128xf32> to vector<1x128xf32>
      %14 = vector.broadcast %13 : vector<1x128xf32> to vector<128x128xf32>
      %c0_12 = arith.constant 0 : index
      %c0_13 = arith.constant 0 : index
      %15 = vector.load %arg12[%c0_12, %c0_13] : memref<128x128xf32, #tpu.memory_space<vmem>>, vector<128x128xf32>
      tpu.vector_store %arg12[%c0_12, %c0_13], %14 {strides = array<i32>} : memref<128x128xf32, #tpu.memory_space<vmem>>, vector<128x128xf32>,
    } else {
    }
    %c0 = arith.constant 0 : index
    %c0_1 = arith.constant 0 : index
    %3 = vector.load %arg12[%c0, %c0_1] : memref<128x128xf32, #tpu.memory_space<vmem>>, vector<128x128xf32>
    %c0_2 = arith.constant 0 : index
    %c0_3 = arith.constant 0 : index
    %4 = vector.load %arg2[%c0_2, %c0_3] : memref<128x128xbf16, #tpu.memory_space<vmem>>, vector<128x128xbf16>
    %c0_4 = arith.constant 0 : index
    %c0_5 = arith.constant 0 : index
    %5 = vector.load %arg3[%c0_4, %c0_5] : memref<128x128xbf16, #tpu.memory_space<vmem>>, vector<128x128xbf16>
    %cst = arith.constant dense<0.000000e+00> : vector<128x128xf32>
    %6 = tpu.matmul %4, %5, %cst {dimension_numbers = #tpu.dot_dimension_numbers<[1], [0], [0], [1], [0, 0, 1, 1], [], []>} : vector<128x128xbf16>, vector<128x128xbf16>, vector<128x128xf32> -> vector<128x128xf32>
    %7 = arith.addf %3, %6 : vector<128x128xf32>
    %c0_6 = arith.constant 0 : index
    %c0_7 = arith.constant 0 : index
    %8 = vector.load %arg12[%c0_6, %c0_7] : memref<128x128xf32, #tpu.memory_space<vmem>>, vector<128x128xf32>
    tpu.vector_store %arg12[%c0_6, %c0_7], %7 {strides = array<i32>} : memref<128x128xf32, #tpu.memory_space<vmem>>, vector<128x128xf32>,
    %c0_i32_8 = arith.constant 0 : i32
    %9 = arith.cmpi eq, %arg1, %c0_i32_8 : i32
    %10 = arith.extui %9 : i1 to i32
    %c0_i32_9 = arith.constant 0 : i32
    %11 = arith.cmpi ne, %10, %c0_i32_9 : i32
    scf.if %11 {
      %c0_10 = arith.constant 0 : index
      %c0_11 = arith.constant 0 : index
      %12 = vector.load %arg12[%c0_10, %c0_11] : memref<128x128xf32, #tpu.memory_space<vmem>>, vector<128x128xf32>
      %cst_12 = arith.constant 0.000000e+00 : f32
      %13 = vector.broadcast %cst_12 : f32 to vector<128x128xf32>
      %14 = arith.maximumf %12, %13 : vector<128x128xf32>
      %15 = arith.truncf %14 : vector<128x128xf32> to vector<128x128xbf16>
      %c0_13 = arith.constant 0 : index
      %c0_14 = arith.constant 0 : index
      %16 = vector.load %arg5[%c0_13, %c0_14] : memref<128x128xbf16, #tpu.memory_space<vmem>>, vector<128x128xbf16>
      %cst_15 = arith.constant dense<0.000000e+00> : vector<128x128xf32>
      %17 = tpu.matmul %15, %16, %cst_15 {dimension_numbers = #tpu.dot_dimension_numbers<[1], [0], [0], [1], [0, 0, 1, 1], [], []>} : vector<128x128xbf16>, vector<128x128xbf16>, vector<128x128xf32> -> vector<128x128xf32>
      %c0_16 = arith.constant 0 : index
      %c0_17 = arith.constant 0 : index
      %18 = vector.load %arg6[%c0_16, %c0_17] : memref<1x128xf32, #tpu.memory_space<vmem>>, vector<1x128xf32>
      %19 = vector.broadcast %18 : vector<1x128xf32> to vector<128x128xf32>
      %20 = arith.addf %17, %19 : vector<128x128xf32>
      %cst_18 = arith.constant 0.000000e+00 : f32
      %21 = vector.broadcast %cst_18 : f32 to vector<128x128xf32>
      %22 = arith.maximumf %20, %21 : vector<128x128xf32>
      %23 = arith.truncf %22 : vector<128x128xf32> to vector<128x128xbf16>
      %c0_19 = arith.constant 0 : index
      %c0_20 = arith.constant 0 : index
      %24 = vector.load %arg7[%c0_19, %c0_20] : memref<128x128xbf16, #tpu.memory_space<vmem>>, vector<128x128xbf16>
      %cst_21 = arith.constant dense<0.000000e+00> : vector<128x128xf32>
      %25 = tpu.matmul %23, %24, %cst_21 {dimension_numbers = #tpu.dot_dimension_numbers<[1], [0], [0], [1], [0, 0, 1, 1], [], []>} : vector<128x128xbf16>, vector<128x128xbf16>, vector<128x128xf32> -> vector<128x128xf32>
      %c0_22 = arith.constant 0 : index
      %c0_23 = arith.constant 0 : index
      %26 = vector.load %arg8[%c0_22, %c0_23] : memref<1x128xf32, #tpu.memory_space<vmem>>, vector<1x128xf32>
      %27 = vector.broadcast %26 : vector<1x128xf32> to vector<128x128xf32>
      %28 = arith.addf %25, %27 : vector<128x128xf32>
      %cst_24 = arith.constant 0.000000e+00 : f32
      %29 = vector.broadcast %cst_24 : f32 to vector<128x128xf32>
      %30 = arith.maximumf %28, %29 : vector<128x128xf32>
      %31 = arith.truncf %30 : vector<128x128xf32> to vector<128x128xbf16>
      %c0_25 = arith.constant 0 : index
      %c0_26 = arith.constant 0 : index
      %32 = vector.load %arg9[%c0_25, %c0_26] : memref<128x128xbf16, #tpu.memory_space<vmem>>, vector<128x128xbf16>
      %cst_27 = arith.constant dense<0.000000e+00> : vector<128x128xf32>
      %33 = tpu.matmul %31, %32, %cst_27 {dimension_numbers = #tpu.dot_dimension_numbers<[1], [0], [0], [1], [0, 0, 1, 1], [], []>} : vector<128x128xbf16>, vector<128x128xbf16>, vector<128x128xf32> -> vector<128x128xf32>
      %c0_28 = arith.constant 0 : index
      %c0_29 = arith.constant 0 : index
      %34 = vector.load %arg10[%c0_28, %c0_29] : memref<1x128xf32, #tpu.memory_space<vmem>>, vector<1x128xf32>
      %35 = vector.broadcast %34 : vector<1x128xf32> to vector<128x128xf32>
      %36 = arith.addf %33, %35 : vector<128x128xf32>
      %37 = arith.negf %36 : vector<128x128xf32>
      %38 = math.exp %37 : vector<128x128xf32>
      %cst_30 = arith.constant 1.000000e+00 : f32
      %39 = vector.broadcast %cst_30 : f32 to vector<128x128xf32>
      %40 = arith.addf %39, %38 : vector<128x128xf32>
      %41 = arith.divf %39, %40 : vector<128x128xf32>
      %c0_31 = arith.constant 0 : index
      %c0_32 = arith.constant 0 : index
      %42 = vector.load %arg11[%c0_31, %c0_32] : memref<128x128xf32, #tpu.memory_space<vmem>>, vector<128x128xf32>
      tpu.vector_store %arg11[%c0_31, %c0_32], %41 {strides = array<i32>} : memref<128x128xf32, #tpu.memory_space<vmem>>, vector<128x128xf32>,
    } else {
    }
    return
  }
  func.func @transform_0(%arg0: i32, %arg1: i32) -> (i32, i32) {
    %c0_i32 = arith.constant 0 : i32
    return %arg0, %arg1 : i32, i32
  }
  func.func @transform_1(%arg0: i32, %arg1: i32) -> (i32, i32) {
    %c0_i32 = arith.constant 0 : i32
    %c0_i32_0 = arith.constant 0 : i32
    return %arg1, %c0_i32 : i32, i32
  }
  func.func @transform_2(%arg0: i32, %arg1: i32) -> (i32, i32) {
    %c0_i32 = arith.constant 0 : i32
    %c0_i32_0 = arith.constant 0 : i32
    %c0_i32_1 = arith.constant 0 : i32
    return %c0_i32, %c0_i32_0 : i32, i32
  }
  func.func @transform_3(%arg0: i32, %arg1: i32) -> (i32, i32) {
    %c0_i32 = arith.constant 0 : i32
    %c0_i32_0 = arith.constant 0 : i32
    %c0_i32_1 = arith.constant 0 : i32
    return %c0_i32, %c0_i32_0 : i32, i32
  }
  func.func @transform_4(%arg0: i32, %arg1: i32) -> (i32, i32) {
    %c0_i32 = arith.constant 0 : i32
    %c0_i32_0 = arith.constant 0 : i32
    %c0_i32_1 = arith.constant 0 : i32
    return %c0_i32, %c0_i32_0 : i32, i32
  }
  func.func @transform_5(%arg0: i32, %arg1: i32) -> (i32, i32) {
    %c0_i32 = arith.constant 0 : i32
    %c0_i32_0 = arith.constant 0 : i32
    %c0_i32_1 = arith.constant 0 : i32
    return %c0_i32, %c0_i32_0 : i32, i32
  }
  func.func @transform_6(%arg0: i32, %arg1: i32) -> (i32, i32) {
    %c0_i32 = arith.constant 0 : i32
    %c0_i32_0 = arith.constant 0 : i32
    %c0_i32_1 = arith.constant 0 : i32
    return %c0_i32, %c0_i32_0 : i32, i32
  }
  func.func @transform_7(%arg0: i32, %arg1: i32) -> (i32, i32) {
    %c0_i32 = arith.constant 0 : i32
    %c0_i32_0 = arith.constant 0 : i32
    %c0_i32_1 = arith.constant 0 : i32
    return %c0_i32, %c0_i32_0 : i32, i32
  }
  func.func @transform_8(%arg0: i32, %arg1: i32) -> (i32, i32) {
    %c0_i32 = arith.constant 0 : i32
    %c0_i32_0 = arith.constant 0 : i32
    %c0_i32_1 = arith.constant 0 : i32
    return %c0_i32, %c0_i32_0 : i32, i32
  }
  func.func @transform_9(%arg0: i32, %arg1: i32) -> (i32, i32) {
    %c0_i32 = arith.constant 0 : i32
    %c0_i32_0 = arith.constant 0 : i32
    return %arg0, %c0_i32 : i32, i32
  }
}

</mosaic_0001>

<bundles_post_ra>
// kernel: gcn_forward_padded.4
= control target key start
LH: loop header
LB: loop body
LE: loop exit
PB: predicated region body
PF: predicated region fallthrough
CT: control target
= control target key end

     0   :  { %s782_s1 = inlined_call_operand.vmem [shape: bf16[128,128], index: 1, kind: input, shape index: {}]   ;;  %s783_s2 = inlined_call_operand.vmem [shape: f32[1,128], index: 2, kind: input, shape index: {}]   ;;  %s784_s0 = inlined_call_operand.vmem [shape: bf16[128,128], index: 0, kind: input, shape index: {}]   ;;  %s785_s3 = inlined_call_operand.vmem [shape: bf16[128,128], index: 3, kind: input, shape index: {}]   ;;  %s786_s4 = inlined_call_operand.vmem [shape: f32[1,128], index: 4, kind: input, shape index: {}]   ;;  %s787_s5 = inlined_call_operand.vmem [shape: bf16[128,128], index: 5, kind: output, shape index: {}]  }
   0x1   :  { %v576_v0 = vld [vmem:[%s782_s1 + $0x38] sm:$0xff]  ;;  %v575_v1 = vld [vmem:[%s782_s1 + $0x30] sm:$0xff]  ;;  %v574_v2 = vld [vmem:[%s782_s1 + $0x28] sm:$0xff] }
   0x2   :  { %188 = vmatpush.bf16.msra.mxu0 %v576_v0  ;;  %632 = vmatpush.bf16.msra.mxu2 %v576_v0  ;;  %v573_v3 = vld [vmem:[%s782_s1 + $0x20] sm:$0xff]  ;;  %v572_v4 = vld [vmem:[%s782_s1 + $0x18] sm:$0xff]  ;;  %v571_v5 = vld [vmem:[%s782_s1 + $0x10] sm:$0xff] }
   0x3   :  { %v570_v6 = vld [vmem:[%s782_s1 + $0x8] sm:$0xff]  ;;  %v569_v7 = vld [vmem:[%s782_s1] sm:$0xff]  ;;  %v584_v12 = vld [vmem:[%s785_s3 + $0x38] sm:$0xff] }
   0x4   :  { %v561_v8 = vld [vmem:[%s784_s0] sm:$0xff]  ;;  %v562_v10 = vld [vmem:[%s784_s0 + $0x8] sm:$0xff]  ;;  %380 = vmatpush.bf16.msra.mxu1 %v584_v12  ;;  %v583_v13 = vld [vmem:[%s785_s3 + $0x30] sm:$0xff]  ;;  %640 = vmatpush.bf16.msra.mxu3 %v584_v12 }
   0x5   :  { %v565_v9 = vld [vmem:[%s784_s0 + $0x20] sm:$0xff]  ;;  %v566_v11 = vld [vmem:[%s784_s0 + $0x28] sm:$0xff]  ;;  %v563_v16 = vld [vmem:[%s784_s0 + $0x10] sm:$0xff] }
   0x6   :  { %189 = vmatpush.bf16.msra.mxu0 %v575_v1  ;;  %633 = vmatpush.bf16.msra.mxu2 %v575_v1  ;;  %v582_v14 = vld [vmem:[%s785_s3 + $0x28] sm:$0xff]  ;;  %v581_v15 = vld [vmem:[%s785_s3 + $0x20] sm:$0xff]  ;;  %v567_v17 = vld [vmem:[%s784_s0 + $0x30] sm:$0xff] }
   0x7   :  { %v564_v18 = vld [vmem:[%s784_s0 + $0x18] sm:$0xff]  ;;  %v579_v21 = vld [vmem:[%s785_s3 + $0x10] sm:$0xff]  ;;  %v578_v22 = vld [vmem:[%s785_s3 + $0x8] sm:$0xff] }
   0x8   :  { %381 = vmatpush.bf16.msra.mxu1 %v583_v13  ;;  %641 = vmatpush.bf16.msra.mxu3 %v583_v13  ;;  %v568_v19 = vld [vmem:[%s784_s0 + $0x38] sm:$0xff]  ;;  %v577_v23 = vld [vmem:[%s785_s3] sm:$0xff] }
   0x9   :  { %v580_v20 = vld [vmem:[%s785_s3 + $0x18] sm:$0xff]  ;;  %v648_v25 = vld [vmem:[%s783_s2] ss:$0 sm:$0xff] }
   0xa   :  { %190 = vmatpush.bf16.msra.mxu0 %v574_v2  ;;  %634 = vmatpush.bf16.msra.mxu2 %v574_v2 }
   0xc   :  { %382 = vmatpush.bf16.msra.mxu1 %v582_v14  ;;  %642 = vmatpush.bf16.msra.mxu3 %v582_v14 }
   0xe   :  { %191 = vmatpush.bf16.msra.mxu0 %v573_v3  ;;  %635 = vmatpush.bf16.msra.mxu2 %v573_v3 }
  0x10   :  { %383 = vmatpush.bf16.msra.mxu1 %v581_v15  ;;  %643 = vmatpush.bf16.msra.mxu3 %v581_v15 }
  0x12   :  { %192 = vmatpush.bf16.msra.mxu0 %v572_v4  ;;  %636 = vmatpush.bf16.msra.mxu2 %v572_v4 }
  0x14   :  { %384 = vmatpush.bf16.msra.mxu1 %v580_v20  ;;  %644 = vmatpush.bf16.msra.mxu3 %v580_v20 }
  0x16   :  { %193 = vmatpush.bf16.msra.mxu0 %v571_v5  ;;  %637 = vmatpush.bf16.msra.mxu2 %v571_v5 }
  0x18   :  { %385 = vmatpush.bf16.msra.mxu1 %v579_v21  ;;  %645 = vmatpush.bf16.msra.mxu3 %v579_v21 }
  0x1a   :  { %194 = vmatpush.bf16.msra.mxu0 %v570_v6  ;;  %638 = vmatpush.bf16.msra.mxu2 %v570_v6 }
  0x1c   :  { %386 = vmatpush.bf16.msra.mxu1 %v578_v22  ;;  %646 = vmatpush.bf16.msra.mxu3 %v578_v22 }
  0x1e   :  { %195 = vmatpush.bf16.msra.mxu0 %v569_v7  ;;  %639 = vmatpush.bf16.msra.mxu2 %v569_v7 }
  0x20   :  { %387 = vmatpush.bf16.msra.mxu1 %v577_v23  ;;  %647 = vmatpush.bf16.msra.mxu3 %v577_v23 }
  0x21   :  { %196 = vmatmul.bf16.vlgmr.msra.gmra.mxu0 %v561_v8  ;;  %216 = vmatmul.bf16.vlgmr.msra.gmra.mxu2 %v565_v9 }
  0x31   :  { %201 = vmatmul.bf16.gmra.mxu0 %v562_v10  ;;  %221 = vmatmul.bf16.gmra.mxu2 %v566_v11 }
  0x41   :  { %206 = vmatmul.bf16.gmra.mxu0 %v563_v16  ;;  %226 = vmatmul.bf16.gmra.mxu2 %v567_v17 }
  0x51   :  { %211 = vmatmul.bf16.gmra.mxu0 %v564_v18  ;;  %231 = vmatmul.bf16.gmra.mxu2 %v568_v19  ;;  %v649_v18 = vld [vmem:[%s786_s4] ss:$0 sm:$0xff] }
  0x9e   :  { %v197_v24 = vpop.f32.mrf.mxu0 }
  0x9f   :  { %v237_v26 = vadd.f32 %v648_v25, %v197_v24 }
  0xa1   :  { %v288_v29 = vmax.f32 %v237_v26, 0.0 }
  0xa4   :  { %v217_v27 = vpop.f32.mrf.mxu2 }
  0xa5   :  { %v245_v32 = vadd.f32 %v648_v25, %v217_v27 }
  0xa6   :  { %v199_v28 = vpop.f32.mrf.mxu0 }
  0xa7   :  { %v238_v30 = vadd.f32 %v648_v25, %v199_v28  ;;  %v296_v37 = vmax.f32 %v245_v32, 0.0 }
  0xa9   :  { %v289_v31 = vmax.f32 %v238_v30, 0.0 }
  0xab   :  { %v304_v33 = vpack.c.bf16 %v289_v31, %v288_v29 }
  0xac   :  { %v219_v34 = vpop.f32.mrf.mxu2 }
  0xad   :  { %v246_v35 = vadd.f32 %v648_v25, %v219_v34  ;;  %388 = vmatmul.bf16.vlgmr.msra.gmra.mxu1 %v304_v33 }
  0xae   :  { %v202_v36 = vpop.f32.mrf.mxu0 }
  0xaf   :  { %v297_v38 = vmax.f32 %v246_v35, 0.0  ;;  %v239_v40 = vadd.f32 %v648_v25, %v202_v36 }
  0xb1   :  { %v308_v39 = vpack.c.bf16 %v297_v38, %v296_v37  ;;  %v290_v43 = vmax.f32 %v239_v40, 0.0 }
  0xb3   :  { %408 = vmatmul.bf16.vlgmr.msra.gmra.mxu3 %v308_v39 }
  0xb4   :  { %v222_v41 = vpop.f32.mrf.mxu2 }
  0xb5   :  { %v247_v46 = vadd.f32 %v648_v25, %v222_v41 }
  0xb6   :  { %v204_v42 = vpop.f32.mrf.mxu0 }
  0xb7   :  { %v240_v44 = vadd.f32 %v648_v25, %v204_v42  ;;  %v298_v51 = vmax.f32 %v247_v46, 0.0 }
  0xb9   :  { %v291_v45 = vmax.f32 %v240_v44, 0.0 }
  0xbb   :  { %v305_v47 = vpack.c.bf16 %v291_v45, %v290_v43 }
  0xbc   :  { %v224_v48 = vpop.f32.mrf.mxu2 }
  0xbd   :  { %v248_v49 = vadd.f32 %v648_v25, %v224_v48  ;;  %393 = vmatmul.bf16.gmra.mxu1 %v305_v47 }
  0xbe   :  { %v207_v50 = vpop.f32.mrf.mxu0 }
  0xbf   :  { %v299_v52 = vmax.f32 %v248_v49, 0.0  ;;  %v241_v54 = vadd.f32 %v648_v25, %v207_v50 }
  0xc1   :  { %v309_v53 = vpack.c.bf16 %v299_v52, %v298_v51  ;;  %v292_v57 = vmax.f32 %v241_v54, 0.0 }
  0xc3   :  { %413 = vmatmul.bf16.gmra.mxu3 %v309_v53 }
  0xc4   :  { %v227_v55 = vpop.f32.mrf.mxu2 }
  0xc5   :  { %v249_v60 = vadd.f32 %v648_v25, %v227_v55 }
  0xc6   :  { %v209_v56 = vpop.f32.mrf.mxu0 }
  0xc7   :  { %v242_v58 = vadd.f32 %v648_v25, %v209_v56  ;;  %v300_v1 = vmax.f32 %v249_v60, 0.0 }
  0xc9   :  { %v293_v59 = vmax.f32 %v242_v58, 0.0 }
  0xcb   :  { %v306_v61 = vpack.c.bf16 %v293_v59, %v292_v57 }
  0xcc   :  { %v229_v62 = vpop.f32.mrf.mxu2 }
  0xcd   :  { %v250_v63 = vadd.f32 %v648_v25, %v229_v62  ;;  %398 = vmatmul.bf16.gmra.mxu1 %v306_v61 }
  0xce   :  { %v212_v0 = vpop.f32.mrf.mxu0 }
  0xcf   :  { %v301_v2 = vmax.f32 %v250_v63, 0.0  ;;  %v243_v4 = vadd.f32 %v648_v25, %v212_v0 }
  0xd1   :  { %v310_v3 = vpack.c.bf16 %v301_v2, %v300_v1  ;;  %v294_v7 = vmax.f32 %v243_v4, 0.0 }
  0xd3   :  { %418 = vmatmul.bf16.gmra.mxu3 %v310_v3 }
  0xd4   :  { %v232_v5 = vpop.f32.mrf.mxu2 }
  0xd5   :  { %v251_v10 = vadd.f32 %v648_v25, %v232_v5 }
  0xd6   :  { %v214_v6 = vpop.f32.mrf.mxu0 }
  0xd7   :  { %v244_v8 = vadd.f32 %v648_v25, %v214_v6  ;;  %v302_v14 = vmax.f32 %v251_v10, 0.0 }
  0xd9   :  { %v295_v9 = vmax.f32 %v244_v8, 0.0 }
  0xdb   :  { %v307_v11 = vpack.c.bf16 %v295_v9, %v294_v7 }
  0xdc   :  { %v234_v12 = vpop.f32.mrf.mxu2 }
  0xdd   :  { %v252_v13 = vadd.f32 %v648_v25, %v234_v12  ;;  %403 = vmatmul.bf16.gmra.mxu1 %v307_v11 }
  0xdf   :  { %v303_v15 = vmax.f32 %v252_v13, 0.0 }
  0xe1   :  { %v311_v16 = vpack.c.bf16 %v303_v15, %v302_v14 }
  0xe3   :  { %423 = vmatmul.bf16.gmra.mxu3 %v311_v16 }
 0x12a   :  { %v389_v17 = vpop.f32.mrf.mxu1 }
 0x12b   :  { %v390_v20 = vadd.f32 %v649_v18, %v389_v17 }
 0x132   :  { %v391_v19 = vpop.f32.mrf.mxu1 }
 0x133   :  { %v392_v21 = vadd.f32 %v649_v18, %v391_v19 }
 0x135   :  { %v588_v22 = vpack.c.bf16 %v392_v21, %v390_v20 }
 0x136   :  { %v409_v23 = vpop.f32.mrf.mxu3 }
 0x137   :  { %589 = vst [vmem:[%s787_s5] sm:$0xff] %v588_v22   ;;  %v410_v26 = vadd.f32 %v649_v18, %v409_v23 }
 0x13a   :  { %v394_v24 = vpop.f32.mrf.mxu1 }
 0x13b   :  { %v395_v30 = vadd.f32 %v649_v18, %v394_v24 }
 0x13e   :  { %v411_v25 = vpop.f32.mrf.mxu3 }
 0x13f   :  { %v412_v27 = vadd.f32 %v649_v18, %v411_v25 }
 0x141   :  { %v608_v28 = vpack.c.bf16 %v412_v27, %v410_v26 }
 0x142   :  { %v396_v29 = vpop.f32.mrf.mxu1 }
 0x143   :  { %628 = vst [vmem:[%s787_s5 + $0x20] sm:$0xff] %v608_v28   ;;  %v397_v31 = vadd.f32 %v649_v18, %v396_v29 }
 0x145   :  { %v593_v32 = vpack.c.bf16 %v397_v31, %v395_v30 }
 0x146   :  { %v414_v33 = vpop.f32.mrf.mxu3 }
 0x147   :  { %625 = vst [vmem:[%s787_s5 + $0x8] sm:$0xff] %v593_v32   ;;  %v415_v36 = vadd.f32 %v649_v18, %v414_v33 }
 0x14a   :  { %v399_v34 = vpop.f32.mrf.mxu1 }
 0x14b   :  { %v400_v40 = vadd.f32 %v649_v18, %v399_v34 }
 0x14e   :  { %v416_v35 = vpop.f32.mrf.mxu3 }
 0x14f   :  { %v417_v37 = vadd.f32 %v649_v18, %v416_v35 }
 0x151   :  { %v613_v38 = vpack.c.bf16 %v417_v37, %v415_v36 }
 0x152   :  { %v401_v39 = vpop.f32.mrf.mxu1 }
 0x153   :  { %629 = vst [vmem:[%s787_s5 + $0x28] sm:$0xff] %v613_v38   ;;  %v402_v41 = vadd.f32 %v649_v18, %v401_v39 }
 0x155   :  { %v598_v42 = vpack.c.bf16 %v402_v41, %v400_v40 }
 0x156   :  { %v419_v43 = vpop.f32.mrf.mxu3 }
 0x157   :  { %626 = vst [vmem:[%s787_s5 + $0x10] sm:$0xff] %v598_v42   ;;  %v420_v46 = vadd.f32 %v649_v18, %v419_v43 }
 0x15a   :  { %v404_v44 = vpop.f32.mrf.mxu1 }
 0x15b   :  { %v405_v50 = vadd.f32 %v649_v18, %v404_v44 }
 0x15e   :  { %v421_v45 = vpop.f32.mrf.mxu3 }
 0x15f   :  { %v422_v47 = vadd.f32 %v649_v18, %v421_v45 }
 0x161   :  { %v618_v48 = vpack.c.bf16 %v422_v47, %v420_v46 }
 0x162   :  { %v406_v49 = vpop.f32.mrf.mxu1 }
 0x163   :  { %630 = vst [vmem:[%s787_s5 + $0x30] sm:$0xff] %v618_v48   ;;  %v407_v51 = vadd.f32 %v649_v18, %v406_v49 }
 0x165   :  { %v603_v52 = vpack.c.bf16 %v407_v51, %v405_v50 }
 0x166   :  { %v424_v53 = vpop.f32.mrf.mxu3 }
 0x167   :  { %627 = vst [vmem:[%s787_s5 + $0x18] sm:$0xff] %v603_v52   ;;  %v425_v55 = vadd.f32 %v649_v18, %v424_v53 }
 0x16e   :  { %v426_v54 = vpop.f32.mrf.mxu3 }
 0x16f   :  { %v427_v56 = vadd.f32 %v649_v18, %v426_v54 }
 0x171   :  { %v623_v57 = vpack.c.bf16 %v427_v56, %v425_v55 }
 0x173   :  { %631 = vst [vmem:[%s787_s5 + $0x38] sm:$0xff] %v623_v57  }

// kernel: gcn_forward_padded.3
= control target key start
LH: loop header
LB: loop body
LE: loop exit
PB: predicated region body
PF: predicated region fallthrough
CT: control target
= control target key end

     0   :  { %8 = vsyncpa [#allocation3], 0  ;;  %s530_s0 = inlined_call_operand.hbm [shape: bf16[128,128], index: 0, kind: input, shape index: {}]   ;;  %s531_s1 = inlined_call_operand.hbm [shape: bf16[128,128], index: 1, kind: input, shape index: {}]   ;;  %s532_s2 = inlined_call_operand.vmem [shape: f32[1,128], index: 2, kind: input, shape index: {}]   ;;  %s533_s3 = inlined_call_operand.vmem [shape: bf16[128,128], index: 3, kind: output, shape index: {}]  }
   0x1   :  { %s14_s14 = sshll.u32 %s530_s0, 4  ;;  %s15_s14 = int_to_ptr.hbm [resolvable:$true] %s14_s14 }
   0x2   :  { %9 = vsyncpa [#allocation5], 0  ;;  %s473_s15 = smov [#allocation2]   ;;  %s27_s19 = sshll.u32 %s531_s1, 4  ;;  %s28_s19 = int_to_ptr.hbm [resolvable:$true] %s27_s19 }
   0x3   :  { %s16_s16 = sshll.u32 %s473_s15, 4  ;;  %s474_s20 = smov 64   ;;  %s17_s16 = int_to_ptr.vmem [resolvable:$true] %s16_s16 }
   0x4   :  { %s475_s21 = smov 4   ;;  %s476_s22 = smov [#allocation4]  }
   0x5   :  { %22 = dma.hbm_to_vmem [thread:$0]  %s15_s14, 1024, %s17_s16, [#allocation3], %s474_s20, %s474_s20, %s475_s21  }
   0x6   :  { %s29_s23 = sshll.u32 %s476_s22, 4  ;;  %s30_s23 = int_to_ptr.vmem [resolvable:$true] %s29_s23 }
   0x7   :  { %35 = dma.hbm_to_vmem [thread:$0]  %s28_s19, 1024, %s30_s23, [#allocation5], %s474_s20, %s474_s20, %s475_s21  }
   0x8   :  { %469 = dma.done.wait [#allocation3], 1024  }
   0x9   :  { %470 = vsyncadd [#allocation3], 4294966272 }
   0xa   :  { %471 = dma.done.wait [#allocation5], 1024  }
   0xb   :  { %472 = vsyncadd [#allocation5], 4294966272  ;;  %v344_v0 = vld [vmem:[#allocation4 + $0x38] sm:$0xff]  ;;  %v343_v1 = vld [vmem:[#allocation4 + $0x30] sm:$0xff] }
   0xc   :  { %178 = vmatpush.bf16.msra.mxu0 %v344_v0  ;;  %392 = vmatpush.bf16.msra.mxu1 %v344_v0  ;;  %v342_v2 = vld [vmem:[#allocation4 + $0x28] sm:$0xff]  ;;  %v341_v3 = vld [vmem:[#allocation4 + $0x20] sm:$0xff]  ;;  %v340_v4 = vld [vmem:[#allocation4 + $0x18] sm:$0xff] }
   0xd   :  { %393 = vmatpush.bf16.msra.mxu2 %v344_v0  ;;  %394 = vmatpush.bf16.msra.mxu3 %v344_v0  ;;  %v339_v5 = vld [vmem:[#allocation4 + $0x10] sm:$0xff]  ;;  %v338_v6 = vld [vmem:[#allocation4 + $0x8] sm:$0xff]  ;;  %v337_v7 = vld [vmem:[#allocation4] sm:$0xff] }
   0xe   :  { %v329_v8 = vld [vmem:[#allocation2] sm:$0xff]  ;;  %v331_v9 = vld [vmem:[#allocation2 + $0x10] sm:$0xff]  ;;  %v330_v12 = vld [vmem:[#allocation2 + $0x8] sm:$0xff] }
   0xf   :  { %v333_v10 = vld [vmem:[#allocation2 + $0x20] sm:$0xff]  ;;  %v335_v11 = vld [vmem:[#allocation2 + $0x30] sm:$0xff]  ;;  %v332_v13 = vld [vmem:[#allocation2 + $0x18] sm:$0xff] }
  0x10   :  { %179 = vmatpush.bf16.msra.mxu0 %v343_v1  ;;  %395 = vmatpush.bf16.msra.mxu1 %v343_v1  ;;  %v334_v14 = vld [vmem:[#allocation2 + $0x28] sm:$0xff]  ;;  %v336_v15 = vld [vmem:[#allocation2 + $0x38] sm:$0xff]  ;;  %v420_v18 = vld [vmem:[%s532_s2] ss:$0 sm:$0xff] }
  0x11   :  { %396 = vmatpush.bf16.msra.mxu2 %v343_v1  ;;  %397 = vmatpush.bf16.msra.mxu3 %v343_v1 }
  0x14   :  { %180 = vmatpush.bf16.msra.mxu0 %v342_v2  ;;  %398 = vmatpush.bf16.msra.mxu1 %v342_v2 }
  0x15   :  { %399 = vmatpush.bf16.msra.mxu2 %v342_v2  ;;  %400 = vmatpush.bf16.msra.mxu3 %v342_v2 }
  0x18   :  { %181 = vmatpush.bf16.msra.mxu0 %v341_v3  ;;  %401 = vmatpush.bf16.msra.mxu1 %v341_v3 }
  0x19   :  { %402 = vmatpush.bf16.msra.mxu2 %v341_v3  ;;  %403 = vmatpush.bf16.msra.mxu3 %v341_v3 }
  0x1c   :  { %182 = vmatpush.bf16.msra.mxu0 %v340_v4  ;;  %404 = vmatpush.bf16.msra.mxu1 %v340_v4 }
  0x1d   :  { %405 = vmatpush.bf16.msra.mxu2 %v340_v4  ;;  %406 = vmatpush.bf16.msra.mxu3 %v340_v4 }
  0x20   :  { %183 = vmatpush.bf16.msra.mxu0 %v339_v5  ;;  %407 = vmatpush.bf16.msra.mxu1 %v339_v5 }
  0x21   :  { %408 = vmatpush.bf16.msra.mxu2 %v339_v5  ;;  %409 = vmatpush.bf16.msra.mxu3 %v339_v5 }
  0x24   :  { %184 = vmatpush.bf16.msra.mxu0 %v338_v6  ;;  %410 = vmatpush.bf16.msra.mxu1 %v338_v6 }
  0x25   :  { %411 = vmatpush.bf16.msra.mxu2 %v338_v6  ;;  %412 = vmatpush.bf16.msra.mxu3 %v338_v6 }
  0x28   :  { %185 = vmatpush.bf16.msra.mxu0 %v337_v7  ;;  %413 = vmatpush.bf16.msra.mxu1 %v337_v7 }
  0x29   :  { %414 = vmatpush.bf16.msra.mxu2 %v337_v7  ;;  %415 = vmatpush.bf16.msra.mxu3 %v337_v7 }
  0x2b   :  { %186 = vmatmul.bf16.vlgmr.msra.gmra.mxu0 %v329_v8  ;;  %196 = vmatmul.bf16.vlgmr.msra.gmra.mxu1 %v331_v9 }
  0x2c   :  { %206 = vmatmul.bf16.vlgmr.msra.gmra.mxu2 %v333_v10  ;;  %216 = vmatmul.bf16.vlgmr.msra.gmra.mxu3 %v335_v11 }
  0x3b   :  { %191 = vmatmul.bf16.gmra.mxu0 %v330_v12  ;;  %201 = vmatmul.bf16.gmra.mxu1 %v332_v13 }
  0x3c   :  { %211 = vmatmul.bf16.gmra.mxu2 %v334_v14  ;;  %221 = vmatmul.bf16.gmra.mxu3 %v336_v15 }
  0xa8   :  { %v187_v16 = vpop.f32.mrf.mxu0  ;;  %v197_v17 = vpop.f32.mrf.mxu1 }
  0xa9   :  { %v188_v23 = vadd.f32 %v420_v18, %v187_v16  ;;  %v198_v24 = vadd.f32 %v420_v18, %v197_v17 }
  0xaf   :  { %v207_v19 = vpop.f32.mrf.mxu2  ;;  %v217_v20 = vpop.f32.mrf.mxu3 }
  0xb0   :  { %v189_v21 = vpop.f32.mrf.mxu0  ;;  %v199_v22 = vpop.f32.mrf.mxu1  ;;  %v208_v31 = vadd.f32 %v420_v18, %v207_v19  ;;  %v218_v32 = vadd.f32 %v420_v18, %v217_v20 }
  0xb1   :  { %v190_v25 = vadd.f32 %v420_v18, %v189_v21  ;;  %v200_v26 = vadd.f32 %v420_v18, %v199_v22 }
  0xb3   :  { %v348_v27 = vpack.c.bf16 %v190_v25, %v188_v23  ;;  %v358_v28 = vpack.c.bf16 %v200_v26, %v198_v24 }
  0xb5   :  { %349 = vst [vmem:[%s533_s3] sm:$0xff] %v348_v27  }
  0xb6   :  { %386 = vst [vmem:[%s533_s3 + $0x10] sm:$0xff] %v358_v28  }
  0xb7   :  { %v209_v29 = vpop.f32.mrf.mxu2  ;;  %v219_v30 = vpop.f32.mrf.mxu3 }
  0xb8   :  { %v210_v33 = vadd.f32 %v420_v18, %v209_v29  ;;  %v220_v34 = vadd.f32 %v420_v18, %v219_v30  ;;  %v192_v35 = vpop.f32.mrf.mxu0  ;;  %v202_v36 = vpop.f32.mrf.mxu1 }
  0xb9   :  { %v193_v43 = vadd.f32 %v420_v18, %v192_v35  ;;  %v203_v44 = vadd.f32 %v420_v18, %v202_v36 }
  0xba   :  { %v368_v37 = vpack.c.bf16 %v210_v33, %v208_v31  ;;  %v378_v38 = vpack.c.bf16 %v220_v34, %v218_v32 }
  0xbc   :  { %388 = vst [vmem:[%s533_s3 + $0x20] sm:$0xff] %v368_v37  }
  0xbd   :  { %390 = vst [vmem:[%s533_s3 + $0x30] sm:$0xff] %v378_v38  }
  0xbf   :  { %v212_v39 = vpop.f32.mrf.mxu2  ;;  %v222_v40 = vpop.f32.mrf.mxu3 }
  0xc0   :  { %v194_v41 = vpop.f32.mrf.mxu0  ;;  %v204_v42 = vpop.f32.mrf.mxu1  ;;  %v213_v51 = vadd.f32 %v420_v18, %v212_v39  ;;  %v223_v52 = vadd.f32 %v420_v18, %v222_v40 }
  0xc1   :  { %v195_v45 = vadd.f32 %v420_v18, %v194_v41  ;;  %v205_v46 = vadd.f32 %v420_v18, %v204_v42 }
  0xc3   :  { %v353_v47 = vpack.c.bf16 %v195_v45, %v193_v43  ;;  %v363_v48 = vpack.c.bf16 %v205_v46, %v203_v44 }
  0xc5   :  { %385 = vst [vmem:[%s533_s3 + $0x8] sm:$0xff] %v353_v47  }
  0xc6   :  { %387 = vst [vmem:[%s533_s3 + $0x18] sm:$0xff] %v363_v48  }
  0xc7   :  { %v214_v49 = vpop.f32.mrf.mxu2  ;;  %v224_v50 = vpop.f32.mrf.mxu3 }
  0xc8   :  { %v215_v53 = vadd.f32 %v420_v18, %v214_v49  ;;  %v225_v54 = vadd.f32 %v420_v18, %v224_v50 }
  0xca   :  { %v373_v55 = vpack.c.bf16 %v215_v53, %v213_v51  ;;  %v383_v56 = vpack.c.bf16 %v225_v54, %v223_v52 }
  0xcc   :  { %389 = vst [vmem:[%s533_s3 + $0x28] sm:$0xff] %v373_v55  }
  0xcd   :  { %391 = vst [vmem:[%s533_s3 + $0x38] sm:$0xff] %v383_v56  }
  0xce   :  { %263 = vsyncpa [#allocation3], 1 }
  0xcf   :  { %264 = vsyncpa [#allocation5], 1 }

// kernel: gcn_forward_padded.5
= control target key start
LH: loop header
LB: loop body
LE: loop exit
PB: predicated region body
PF: predicated region fallthrough
CT: control target
= control target key end

     0   :  { %s1617_s0 = inlined_call_operand.vmem [shape: bf16[128,128], index: 0, kind: input, shape index: {}]   ;;  %s1618_s1 = inlined_call_operand.vmem [shape: bf16[128,128], index: 1, kind: input, shape index: {}]   ;;  %s1619_s2 = inlined_call_operand.vmem [shape: f32[1,128], index: 2, kind: input, shape index: {}]   ;;  %s1620_s3 = inlined_call_operand.vmem [shape: bf16[128,128], index: 3, kind: input, shape index: {}]   ;;  %s1621_s4 = inlined_call_operand.vmem [shape: f32[1,128], index: 4, kind: input, shape index: {}]   ;;  %s1622_s5 = inlined_call_operand.vmem [shape: bf16[128,128], index: 5, kind: input, shape index: {}]   ;;  %s1623_s6 = inlined_call_operand.vmem [shape: f32[1,128], index: 6, kind: input, shape index: {}]   ;;  %s1624_s7 = inlined_call_operand.vmem [shape: bf16[128,128], index: 7, kind: input, shape index: {}]   ;;  %s1625_s8 = inlined_call_operand.vmem [shape: f32[1,128], index: 8, kind: input, shape index: {}]   ;;  %s1626_s9 = inlined_call_operand.hbm [shape: f32[128,128], index: 9, kind: output, shape index: {}]  }
   0x1   :  { %v1253_v0 = vld [vmem:[%s1618_s1 + $0x38] sm:$0xff]  ;;  %v1252_v1 = vld [vmem:[%s1618_s1 + $0x30] sm:$0xff] }
   0x2   :  { %201 = vmatpush.bf16.msra.mxu0 %v1253_v0 }
   0x3   :  { %14 = vsyncpa [#allocation4], 0  ;;  %v1251_v2 = vld [vmem:[%s1618_s1 + $0x28] sm:$0xff]  ;;  %v1250_v3 = vld [vmem:[%s1618_s1 + $0x20] sm:$0xff]  ;;  %s1050_s24 = sshll.u32 %s1626_s9, 4  ;;  %s1376_s25 = smov 128   ;;  %s1051_s24 = int_to_ptr.hbm [resolvable:$true] %s1050_s24 }
   0x4   :  { %v1249_v4 = vld [vmem:[%s1618_s1 + $0x18] sm:$0xff]  ;;  %v1248_v5 = vld [vmem:[%s1618_s1 + $0x10] sm:$0xff]  ;;  %v1247_v6 = vld [vmem:[%s1618_s1 + $0x8] sm:$0xff]  ;;  %s1377_s26 = smov 8  }
   0x5   :  { %v1246_v7 = vld [vmem:[%s1618_s1] sm:$0xff]  ;;  %v1239_v9 = vld [vmem:[%s1617_s0 + $0x8] sm:$0xff]  ;;  %v1240_v10 = vld [vmem:[%s1617_s0 + $0x10] sm:$0xff] }
   0x6   :  { %202 = vmatpush.bf16.msra.mxu0 %v1252_v1  ;;  %v1238_v8 = vld [vmem:[%s1617_s0] sm:$0xff]  ;;  %v1241_v11 = vld [vmem:[%s1617_s0 + $0x18] sm:$0xff]  ;;  %v1243_v14 = vld [vmem:[%s1617_s0 + $0x28] sm:$0xff] }
   0x7   :  { %v1242_v12 = vld [vmem:[%s1617_s0 + $0x20] sm:$0xff]  ;;  %v1261_v13 = vld [vmem:[%s1620_s3 + $0x38] sm:$0xff]  ;;  %v1260_v15 = vld [vmem:[%s1620_s3 + $0x30] sm:$0xff] }
   0x8   :  { %393 = vmatpush.bf16.msra.mxu1 %v1261_v13  ;;  %v1259_v16 = vld [vmem:[%s1620_s3 + $0x28] sm:$0xff]  ;;  %v1258_v17 = vld [vmem:[%s1620_s3 + $0x20] sm:$0xff]  ;;  %v1257_v18 = vld [vmem:[%s1620_s3 + $0x18] sm:$0xff] }
   0x9   :  { %v1244_v19 = vld [vmem:[%s1617_s0 + $0x30] sm:$0xff]  ;;  %v1255_v21 = vld [vmem:[%s1620_s3 + $0x8] sm:$0xff]  ;;  %v1254_v22 = vld [vmem:[%s1620_s3] sm:$0xff] }
   0xa   :  { %203 = vmatpush.bf16.msra.mxu0 %v1251_v2  ;;  %v1256_v20 = vld [vmem:[%s1620_s3 + $0x10] sm:$0xff]  ;;  %v1245_v23 = vld [vmem:[%s1617_s0 + $0x38] sm:$0xff]  ;;  %v1503_v25 = vld [vmem:[%s1619_s2] ss:$0 sm:$0xff] }
   0xb   :  { %v1269_v0 = vld [vmem:[%s1622_s5 + $0x38] sm:$0xff] }
   0xc   :  { %394 = vmatpush.bf16.msra.mxu1 %v1260_v15  ;;  %534 = vmatpush.bf16.msra.mxu2 %v1269_v0  ;;  %v1264_v15 = vld [vmem:[%s1622_s5 + $0x10] sm:$0xff] }
   0xe   :  { %204 = vmatpush.bf16.msra.mxu0 %v1250_v3 }
  0x10   :  { %395 = vmatpush.bf16.msra.mxu1 %v1259_v16 }
  0x12   :  { %205 = vmatpush.bf16.msra.mxu0 %v1249_v4  ;;  %v1268_v4 = vld [vmem:[%s1622_s5 + $0x30] sm:$0xff] }
  0x13   :  { %535 = vmatpush.bf16.msra.mxu2 %v1268_v4  ;;  %v1277_v4 = vld [vmem:[%s1624_s7 + $0x38] sm:$0xff] }
  0x14   :  { %396 = vmatpush.bf16.msra.mxu1 %v1258_v17  ;;  %v1263_v17 = vld [vmem:[%s1622_s5 + $0x8] sm:$0xff]  ;;  %675 = vmatpush.bf16.msra.mxu3 %v1277_v4 }
  0x16   :  { %206 = vmatpush.bf16.msra.mxu0 %v1248_v5 }
  0x18   :  { %397 = vmatpush.bf16.msra.mxu1 %v1257_v18  ;;  %v1262_v18 = vld [vmem:[%s1622_s5] sm:$0xff] }
  0x1a   :  { %207 = vmatpush.bf16.msra.mxu0 %v1247_v6  ;;  %v1267_v6 = vld [vmem:[%s1622_s5 + $0x28] sm:$0xff] }
  0x1b   :  { %536 = vmatpush.bf16.msra.mxu2 %v1267_v6  ;;  %v1276_v6 = vld [vmem:[%s1624_s7 + $0x30] sm:$0xff] }
  0x1c   :  { %398 = vmatpush.bf16.msra.mxu1 %v1256_v20  ;;  %676 = vmatpush.bf16.msra.mxu3 %v1276_v6 }
  0x1e   :  { %208 = vmatpush.bf16.msra.mxu0 %v1246_v7  ;;  %v1266_v7 = vld [vmem:[%s1622_s5 + $0x20] sm:$0xff] }
  0x1f   :  { %537 = vmatpush.bf16.msra.mxu2 %v1266_v7  ;;  %v1275_v7 = vld [vmem:[%s1624_s7 + $0x28] sm:$0xff] }
  0x20   :  { %399 = vmatpush.bf16.msra.mxu1 %v1255_v21  ;;  %677 = vmatpush.bf16.msra.mxu3 %v1275_v7 }
  0x21   :  { %209 = vmatmul.bf16.vlgmr.msra.gmra.mxu0 %v1238_v8 }
  0x24   :  { %400 = vmatpush.bf16.msra.mxu1 %v1254_v22 }
  0x31   :  { %214 = vmatmul.bf16.gmra.mxu0 %v1239_v9 }
  0x41   :  { %219 = vmatmul.bf16.gmra.mxu0 %v1240_v10 }
  0x51   :  { %224 = vmatmul.bf16.gmra.mxu0 %v1241_v11  ;;  %v1265_v11 = vld [vmem:[%s1622_s5 + $0x18] sm:$0xff] }
  0x52   :  { %538 = vmatpush.bf16.msra.mxu2 %v1265_v11  ;;  %v1274_v11 = vld [vmem:[%s1624_s7 + $0x20] sm:$0xff] }
  0x53   :  { %678 = vmatpush.bf16.msra.mxu3 %v1274_v11 }
  0x56   :  { %539 = vmatpush.bf16.msra.mxu2 %v1264_v15 }
  0x5a   :  { %540 = vmatpush.bf16.msra.mxu2 %v1263_v17  ;;  %v1272_v17 = vld [vmem:[%s1624_s7 + $0x10] sm:$0xff] }
  0x5e   :  { %541 = vmatpush.bf16.msra.mxu2 %v1262_v18 }
  0x61   :  { %229 = vmatmul.bf16.gmra.mxu0 %v1242_v12 }
  0x71   :  { %234 = vmatmul.bf16.gmra.mxu0 %v1243_v14 }
  0x81   :  { %239 = vmatmul.bf16.gmra.mxu0 %v1244_v19 }
  0x91   :  { %244 = vmatmul.bf16.gmra.mxu0 %v1245_v23 }
  0x9e   :  { %v210_v24 = vpop.f32.mrf.mxu0 }
  0x9f   :  { %v250_v26 = vadd.f32 %v1503_v25, %v210_v24 }
  0xa1   :  { %v301_v29 = vmax.f32 %v250_v26, 0.0 }
  0xa6   :  { %v212_v27 = vpop.f32.mrf.mxu0 }
  0xa7   :  { %v251_v28 = vadd.f32 %v1503_v25, %v212_v27  ;;  %v1548_v27 = vld [vmem:[%s1621_s4] ss:$0 sm:$0xff] }
  0xa9   :  { %v302_v30 = vmax.f32 %v251_v28, 0.0 }
  0xab   :  { %v317_v31 = vpack.c.bf16 %v302_v30, %v301_v29 }
  0xad   :  { %401 = vmatmul.bf16.vlgmr.msra.gmra.mxu1 %v317_v31 }
  0xae   :  { %v215_v32 = vpop.f32.mrf.mxu0 }
  0xaf   :  { %v252_v33 = vadd.f32 %v1503_v25, %v215_v32 }
  0xb1   :  { %v303_v36 = vmax.f32 %v252_v33, 0.0 }
  0xb6   :  { %v217_v34 = vpop.f32.mrf.mxu0 }
  0xb7   :  { %v253_v35 = vadd.f32 %v1503_v25, %v217_v34 }
  0xb9   :  { %v304_v37 = vmax.f32 %v253_v35, 0.0 }
  0xbb   :  { %v318_v38 = vpack.c.bf16 %v304_v37, %v303_v36 }
  0xbd   :  { %406 = vmatmul.bf16.gmra.mxu1 %v318_v38 }
  0xbe   :  { %v220_v39 = vpop.f32.mrf.mxu0 }
  0xbf   :  { %v254_v40 = vadd.f32 %v1503_v25, %v220_v39 }
  0xc1   :  { %v305_v43 = vmax.f32 %v254_v40, 0.0 }
  0xc6   :  { %v222_v41 = vpop.f32.mrf.mxu0 }
  0xc7   :  { %v255_v42 = vadd.f32 %v1503_v25, %v222_v41 }
  0xc9   :  { %v306_v44 = vmax.f32 %v255_v42, 0.0 }
  0xcb   :  { %v319_v45 = vpack.c.bf16 %v306_v44, %v305_v43 }
  0xcd   :  { %411 = vmatmul.bf16.gmra.mxu1 %v319_v45 }
  0xce   :  { %v225_v46 = vpop.f32.mrf.mxu0 }
  0xcf   :  { %v256_v47 = vadd.f32 %v1503_v25, %v225_v46 }
  0xd1   :  { %v307_v50 = vmax.f32 %v256_v47, 0.0 }
  0xd6   :  { %v227_v48 = vpop.f32.mrf.mxu0 }
  0xd7   :  { %v257_v49 = vadd.f32 %v1503_v25, %v227_v48 }
  0xd9   :  { %v308_v51 = vmax.f32 %v257_v49, 0.0 }
  0xdb   :  { %v320_v52 = vpack.c.bf16 %v308_v51, %v307_v50 }
  0xdd   :  { %416 = vmatmul.bf16.gmra.mxu1 %v320_v52 }
  0xde   :  { %v230_v53 = vpop.f32.mrf.mxu0 }
  0xdf   :  { %v258_v54 = vadd.f32 %v1503_v25, %v230_v53 }
  0xe1   :  { %v309_v57 = vmax.f32 %v258_v54, 0.0 }
  0xe6   :  { %v232_v55 = vpop.f32.mrf.mxu0 }
  0xe7   :  { %v259_v56 = vadd.f32 %v1503_v25, %v232_v55 }
  0xe9   :  { %v310_v58 = vmax.f32 %v259_v56, 0.0 }
  0xeb   :  { %v321_v59 = vpack.c.bf16 %v310_v58, %v309_v57 }
  0xed   :  { %421 = vmatmul.bf16.gmra.mxu1 %v321_v59 }
  0xee   :  { %v235_v60 = vpop.f32.mrf.mxu0 }
  0xef   :  { %v260_v61 = vadd.f32 %v1503_v25, %v235_v60 }
  0xf1   :  { %v311_v1 = vmax.f32 %v260_v61, 0.0 }
  0xf6   :  { %v237_v62 = vpop.f32.mrf.mxu0 }
  0xf7   :  { %v261_v63 = vadd.f32 %v1503_v25, %v237_v62 }
  0xf9   :  { %v312_v2 = vmax.f32 %v261_v63, 0.0 }
  0xfb   :  { %v322_v3 = vpack.c.bf16 %v312_v2, %v311_v1 }
  0xfd   :  { %426 = vmatmul.bf16.gmra.mxu1 %v322_v3 }
  0xfe   :  { %v240_v5 = vpop.f32.mrf.mxu0 }
  0xff   :  { %v262_v8 = vadd.f32 %v1503_v25, %v240_v5 }
 0x101   :  { %v313_v12 = vmax.f32 %v262_v8, 0.0 }
 0x106   :  { %v242_v9 = vpop.f32.mrf.mxu0 }
 0x107   :  { %v263_v10 = vadd.f32 %v1503_v25, %v242_v9 }
 0x109   :  { %v314_v13 = vmax.f32 %v263_v10, 0.0 }
 0x10b   :  { %v323_v14 = vpack.c.bf16 %v314_v13, %v313_v12 }
 0x10d   :  { %431 = vmatmul.bf16.gmra.mxu1 %v323_v14 }
 0x10e   :  { %v245_v16 = vpop.f32.mrf.mxu0 }
 0x10f   :  { %v264_v19 = vadd.f32 %v1503_v25, %v245_v16  ;;  %v1273_v16 = vld [vmem:[%s1624_s7 + $0x18] sm:$0xff] }
 0x110   :  { %679 = vmatpush.bf16.msra.mxu3 %v1273_v16 }
 0x111   :  { %v315_v22 = vmax.f32 %v264_v19, 0.0 }
 0x114   :  { %680 = vmatpush.bf16.msra.mxu3 %v1272_v17 }
 0x116   :  { %v247_v20 = vpop.f32.mrf.mxu0 }
 0x117   :  { %v265_v21 = vadd.f32 %v1503_v25, %v247_v20  ;;  %v1271_v20 = vld [vmem:[%s1624_s7 + $0x8] sm:$0xff] }
 0x118   :  { %681 = vmatpush.bf16.msra.mxu3 %v1271_v20 }
 0x119   :  { %v316_v23 = vmax.f32 %v265_v21, 0.0 }
 0x11b   :  { %v324_v24 = vpack.c.bf16 %v316_v23, %v315_v22 }
 0x11d   :  { %436 = vmatmul.bf16.gmra.mxu1 %v324_v24  ;;  %v1270_v24 = vld [vmem:[%s1624_s7] sm:$0xff] }
 0x11e   :  { %682 = vmatpush.bf16.msra.mxu3 %v1270_v24 }
 0x12a   :  { %v402_v26 = vpop.f32.mrf.mxu1 }
 0x12b   :  { %v403_v28 = vadd.f32 %v1548_v27, %v402_v26 }
 0x12d   :  { %v442_v31 = vmax.f32 %v403_v28, 0.0 }
 0x132   :  { %v404_v29 = vpop.f32.mrf.mxu1 }
 0x133   :  { %v405_v30 = vadd.f32 %v1548_v27, %v404_v29  ;;  %v1283_v29 = vld [vmem:[%s1623_s6] ss:$0 sm:$0xff] }
 0x135   :  { %v443_v32 = vmax.f32 %v405_v30, 0.0 }
 0x137   :  { %v458_v33 = vpack.c.bf16 %v443_v32, %v442_v31 }
 0x139   :  { %542 = vmatmul.bf16.vlgmr.msra.gmra.mxu2 %v458_v33 }
 0x13a   :  { %v407_v25 = vpop.f32.mrf.mxu1 }
 0x13b   :  { %v408_v34 = vadd.f32 %v1548_v27, %v407_v25 }
 0x13d   :  { %v444_v37 = vmax.f32 %v408_v34, 0.0 }
 0x142   :  { %v409_v35 = vpop.f32.mrf.mxu1 }
 0x143   :  { %v410_v36 = vadd.f32 %v1548_v27, %v409_v35 }
 0x145   :  { %v445_v38 = vmax.f32 %v410_v36, 0.0 }
 0x147   :  { %v459_v39 = vpack.c.bf16 %v445_v38, %v444_v37 }
 0x149   :  { %547 = vmatmul.bf16.gmra.mxu2 %v459_v39 }
 0x14a   :  { %v412_v40 = vpop.f32.mrf.mxu1 }
 0x14b   :  { %v413_v41 = vadd.f32 %v1548_v27, %v412_v40 }
 0x14d   :  { %v446_v44 = vmax.f32 %v413_v41, 0.0 }
 0x152   :  { %v414_v42 = vpop.f32.mrf.mxu1 }
 0x153   :  { %v415_v43 = vadd.f32 %v1548_v27, %v414_v42 }
 0x155   :  { %v447_v45 = vmax.f32 %v415_v43, 0.0 }
 0x157   :  { %v460_v46 = vpack.c.bf16 %v447_v45, %v446_v44 }
 0x159   :  { %552 = vmatmul.bf16.gmra.mxu2 %v460_v46 }
 0x15a   :  { %v417_v47 = vpop.f32.mrf.mxu1 }
 0x15b   :  { %v418_v48 = vadd.f32 %v1548_v27, %v417_v47 }
 0x15d   :  { %v448_v51 = vmax.f32 %v418_v48, 0.0 }
 0x162   :  { %v419_v49 = vpop.f32.mrf.mxu1 }
 0x163   :  { %v420_v50 = vadd.f32 %v1548_v27, %v419_v49 }
 0x165   :  { %v449_v52 = vmax.f32 %v420_v50, 0.0 }
 0x167   :  { %v461_v53 = vpack.c.bf16 %v449_v52, %v448_v51 }
 0x169   :  { %557 = vmatmul.bf16.gmra.mxu2 %v461_v53 }
 0x16a   :  { %v422_v54 = vpop.f32.mrf.mxu1 }
 0x16b   :  { %v423_v55 = vadd.f32 %v1548_v27, %v422_v54 }
 0x16d   :  { %v450_v58 = vmax.f32 %v423_v55, 0.0 }
 0x172   :  { %v424_v56 = vpop.f32.mrf.mxu1 }
 0x173   :  { %v425_v57 = vadd.f32 %v1548_v27, %v424_v56 }
 0x175   :  { %v451_v59 = vmax.f32 %v425_v57, 0.0 }
 0x177   :  { %v462_v60 = vpack.c.bf16 %v451_v59, %v450_v58 }
 0x179   :  { %562 = vmatmul.bf16.gmra.mxu2 %v462_v60 }
 0x17a   :  { %v427_v61 = vpop.f32.mrf.mxu1 }
 0x17b   :  { %v428_v62 = vadd.f32 %v1548_v27, %v427_v61 }
 0x17d   :  { %v452_v1 = vmax.f32 %v428_v62, 0.0 }
 0x182   :  { %v429_v63 = vpop.f32.mrf.mxu1 }
 0x183   :  { %v430_v0 = vadd.f32 %v1548_v27, %v429_v63 }
 0x185   :  { %v453_v2 = vmax.f32 %v430_v0, 0.0 }
 0x187   :  { %v463_v3 = vpack.c.bf16 %v453_v2, %v452_v1 }
 0x189   :  { %567 = vmatmul.bf16.gmra.mxu2 %v463_v3 }
 0x18a   :  { %v432_v5 = vpop.f32.mrf.mxu1 }
 0x18b   :  { %v433_v8 = vadd.f32 %v1548_v27, %v432_v5 }
 0x18d   :  { %v454_v12 = vmax.f32 %v433_v8, 0.0 }
 0x192   :  { %v434_v9 = vpop.f32.mrf.mxu1 }
 0x193   :  { %v435_v10 = vadd.f32 %v1548_v27, %v434_v9 }
 0x195   :  { %v455_v13 = vmax.f32 %v435_v10, 0.0 }
 0x197   :  { %v464_v14 = vpack.c.bf16 %v455_v13, %v454_v12 }
 0x199   :  { %572 = vmatmul.bf16.gmra.mxu2 %v464_v14 }
 0x19a   :  { %v437_v15 = vpop.f32.mrf.mxu1 }
 0x19b   :  { %v438_v18 = vadd.f32 %v1548_v27, %v437_v15 }
 0x19d   :  { %v456_v22 = vmax.f32 %v438_v18, 0.0 }
 0x1a2   :  { %v439_v19 = vpop.f32.mrf.mxu1 }
 0x1a3   :  { %v440_v21 = vadd.f32 %v1548_v27, %v439_v19  ;;  %v1596_v19 = vld [vmem:[%s1625_s8] ss:$0 sm:$0xff]  ;;  %s1375_s8 = smov [#allocation3]  }
 0x1a4   :  { %s1048_s21 = sshll.u32 %s1375_s8, 4  ;;  %s1049_s21 = int_to_ptr.vmem [resolvable:$true] %s1048_s21 }
 0x1a5   :  { %v457_v23 = vmax.f32 %v440_v21, 0.0 }
 0x1a7   :  { %v465_v26 = vpack.c.bf16 %v457_v23, %v456_v22 }
 0x1a9   :  { %577 = vmatmul.bf16.gmra.mxu2 %v465_v26 }
 0x1bc   :  { %v543_v28 = vpop.f32.mrf.mxu2 }
 0x1bd   :  { %v544_v30 = vadd.f32 %v1283_v29, %v543_v28 }
 0x1bf   :  { %v583_v33 = vmax.f32 %v544_v30, 0.0 }
 0x1c4   :  { %v545_v31 = vpop.f32.mrf.mxu2 }
 0x1c5   :  { %v546_v32 = vadd.f32 %v1283_v29, %v545_v31 }
 0x1c7   :  { %v584_v27 = vmax.f32 %v546_v32, 0.0 }
 0x1c9   :  { %v599_v25 = vpack.c.bf16 %v584_v27, %v583_v33 }
 0x1cb   :  { %683 = vmatmul.bf16.vlgmr.msra.gmra.mxu3 %v599_v25 }
 0x1cc   :  { %v548_v34 = vpop.f32.mrf.mxu2 }
 0x1cd   :  { %v549_v35 = vadd.f32 %v1283_v29, %v548_v34 }
 0x1cf   :  { %v585_v38 = vmax.f32 %v549_v35, 0.0 }
 0x1d4   :  { %v550_v36 = vpop.f32.mrf.mxu2 }
 0x1d5   :  { %v551_v37 = vadd.f32 %v1283_v29, %v550_v36 }
 0x1d7   :  { %v586_v39 = vmax.f32 %v551_v37, 0.0 }
 0x1d9   :  { %v600_v40 = vpack.c.bf16 %v586_v39, %v585_v38 }
 0x1db   :  { %688 = vmatmul.bf16.gmra.mxu3 %v600_v40 }
 0x1dc   :  { %v553_v41 = vpop.f32.mrf.mxu2 }
 0x1dd   :  { %v554_v42 = vadd.f32 %v1283_v29, %v553_v41 }
 0x1df   :  { %v587_v45 = vmax.f32 %v554_v42, 0.0 }
 0x1e4   :  { %v555_v43 = vpop.f32.mrf.mxu2 }
 0x1e5   :  { %v556_v44 = vadd.f32 %v1283_v29, %v555_v43 }
 0x1e7   :  { %v588_v46 = vmax.f32 %v556_v44, 0.0 }
 0x1e9   :  { %v601_v47 = vpack.c.bf16 %v588_v46, %v587_v45 }
 0x1eb   :  { %693 = vmatmul.bf16.gmra.mxu3 %v601_v47 }
 0x1ec   :  { %v558_v48 = vpop.f32.mrf.mxu2 }
 0x1ed   :  { %v559_v49 = vadd.f32 %v1283_v29, %v558_v48 }
 0x1ef   :  { %v589_v52 = vmax.f32 %v559_v49, 0.0 }
 0x1f4   :  { %v560_v50 = vpop.f32.mrf.mxu2 }
 0x1f5   :  { %v561_v51 = vadd.f32 %v1283_v29, %v560_v50 }
 0x1f7   :  { %v590_v53 = vmax.f32 %v561_v51, 0.0 }
 0x1f9   :  { %v602_v54 = vpack.c.bf16 %v590_v53, %v589_v52 }
 0x1fb   :  { %698 = vmatmul.bf16.gmra.mxu3 %v602_v54 }
 0x1fc   :  { %v563_v55 = vpop.f32.mrf.mxu2 }
 0x1fd   :  { %v564_v56 = vadd.f32 %v1283_v29, %v563_v55 }
 0x1ff   :  { %v591_v59 = vmax.f32 %v564_v56, 0.0 }
 0x204   :  { %v565_v57 = vpop.f32.mrf.mxu2 }
 0x205   :  { %v566_v58 = vadd.f32 %v1283_v29, %v565_v57 }
 0x207   :  { %v592_v60 = vmax.f32 %v566_v58, 0.0 }
 0x209   :  { %v603_v61 = vpack.c.bf16 %v592_v60, %v591_v59 }
 0x20b   :  { %703 = vmatmul.bf16.gmra.mxu3 %v603_v61 }
 0x20c   :  { %v568_v62 = vpop.f32.mrf.mxu2 }
 0x20d   :  { %v569_v63 = vadd.f32 %v1283_v29, %v568_v62 }
 0x20f   :  { %v593_v2 = vmax.f32 %v569_v63, 0.0 }
 0x214   :  { %v570_v0 = vpop.f32.mrf.mxu2 }
 0x215   :  { %v571_v1 = vadd.f32 %v1283_v29, %v570_v0 }
 0x217   :  { %v594_v3 = vmax.f32 %v571_v1, 0.0 }
 0x219   :  { %v604_v4 = vpack.c.bf16 %v594_v3, %v593_v2 }
 0x21b   :  { %708 = vmatmul.bf16.gmra.mxu3 %v604_v4 }
 0x21c   :  { %v573_v5 = vpop.f32.mrf.mxu2 }
 0x21d   :  { %v574_v6 = vadd.f32 %v1283_v29, %v573_v5 }
 0x21f   :  { %v595_v9 = vmax.f32 %v574_v6, 0.0 }
 0x224   :  { %v575_v7 = vpop.f32.mrf.mxu2 }
 0x225   :  { %v576_v8 = vadd.f32 %v1283_v29, %v575_v7 }
 0x227   :  { %v596_v10 = vmax.f32 %v576_v8, 0.0 }
 0x229   :  { %v605_v11 = vpack.c.bf16 %v596_v10, %v595_v9 }
 0x22b   :  { %713 = vmatmul.bf16.gmra.mxu3 %v605_v11 }
 0x22c   :  { %v578_v12 = vpop.f32.mrf.mxu2 }
 0x22d   :  { %v579_v13 = vadd.f32 %v1283_v29, %v578_v12 }
 0x22f   :  { %v597_v16 = vmax.f32 %v579_v13, 0.0 }
 0x234   :  { %v580_v14 = vpop.f32.mrf.mxu2 }
 0x235   :  { %v581_v15 = vadd.f32 %v1283_v29, %v580_v14 }
 0x237   :  { %v598_v17 = vmax.f32 %v581_v15, 0.0 }
 0x239   :  { %v606_v18 = vpack.c.bf16 %v598_v17, %v597_v16 }
 0x23b   :  { %718 = vmatmul.bf16.gmra.mxu3 %v606_v18 }
 0x24e   :  { %v684_v20 = vpop.f32.mrf.mxu3 }
 0x24f   :  { %v685_v21 = vadd.f32 %v1596_v19, %v684_v20 }
 0x251   :  { %v1222_v22 = vmul.f32 -1.442695, %v685_v21 }
 0x253   :  { %1285 = vpow2.f32 %v1222_v22 }
 0x256   :  { %v686_v23 = vpop.f32.mrf.mxu3 }
 0x257   :  { %v687_v24 = vadd.f32 %v1596_v19, %v686_v23 }
 0x259   :  { %v1286_v26 = vpop.eup %1285  ;;  %v1223_v28 = vmul.f32 -1.442695, %v687_v24 }
 0x25a   :  { %v772_v29 = vadd.f32 1.0, %v1286_v26 }
 0x25b   :  { %1287 = vpow2.f32 %v1223_v28 }
 0x25c   :  { %1289 = vrcp.f32 %v772_v29  ;;  %v799_v36 = vand.u32 2147483648, %v772_v29  ;;  %v797_v39 = vand.u32 2147483647, %v772_v29  ;;  %vm793_vm1 = vweird.f32 %v772_v29 }
 0x25e   :  { %v689_v30 = vpop.f32.mrf.mxu3  ;;  %v800_v45 = vor.u32 1.1754944e-38, %v799_v36  ;;  %vm798_vm3 = vcmp.eq.f32.partialorder %v797_v39, 8.507059e+37 }
 0x25f   :  { %v690_v31 = vadd.f32 %v1596_v19, %v689_v30 }
 0x261   :  { %v1288_v32 = vpop.eup %1287  ;;  %v1224_v33 = vmul.f32 -1.442695, %v690_v31 }
 0x262   :  { %v1290_v27 = vpop.eup %1289  ;;  %v773_v25 = vadd.f32 1.0, %v1288_v32 }
 0x263   :  { %v789_v34 = vmul.f32 %v1290_v27, %v772_v29  ;;  %1291 = vpow2.f32 %v1224_v33  ;;  %vm794_vm0 = vweird.f32 %v1290_v27 }
 0x264   :  { %1293 = vrcp.f32 %v773_v25  ;;  %vm795_vm2 = vmor %vm793_vm1, %vm794_vm0  ;;  %v814_v51 = vand.u32 2147483648, %v773_v25  ;;  %v812_v54 = vand.u32 2147483647, %v773_v25  ;;  %vm808_vm5 = vweird.f32 %v773_v25 }
 0x265   :  { %v790_v35 = vsub.f32 1.0, %v789_v34 }
 0x266   :  { %v691_v37 = vpop.f32.mrf.mxu3  ;;  %v815_v60 = vor.u32 1.1754944e-38, %v814_v51  ;;  %vm813_vm7 = vcmp.eq.f32.partialorder %v812_v54, 8.507059e+37 }
 0x267   :  { %v791_v38 = vmul.f32 %v1290_v27, %v790_v35  ;;  %v692_v40 = vadd.f32 %v1596_v19, %v691_v37 }
 0x269   :  { %v1292_v41 = vpop.eup %1291  ;;  %v792_v42 = vadd.f32 %v1290_v27, %v791_v38  ;;  %v1225_v43 = vmul.f32 -1.442695, %v692_v40 }
 0x26a   :  { %v1294_v44 = vpop.eup %1293  ;;  %v774_v46 = vadd.f32 1.0, %v1292_v41 }
 0x26b   :  { %v796_v47 = vsel %vm795_vm2, %v1290_v27, %v792_v42  ;;  %v804_v48 = vmul.f32 %v1294_v44, %v773_v25  ;;  %1295 = vpow2.f32 %v1225_v43  ;;  %vm809_vm4 = vweird.f32 %v1294_v44 }
 0x26c   :  { %v801_v49 = vsel %vm798_vm3, %v800_v45, %v796_v47  ;;  %1297 = vrcp.f32 %v774_v46  ;;  %vm810_vm6 = vmor %vm808_vm5, %vm809_vm4  ;;  %v829_v2 = vand.u32 2147483648, %v774_v46  ;;  %v827_v5 = vand.u32 2147483647, %v774_v46 }
 0x26d   :  { %1028 = vst [vmem:[#allocation3] sm:$0xff] %v801_v49  ;;  %v805_v50 = vsub.f32 1.0, %v804_v48  ;;  %vm823_vm9 = vweird.f32 %v774_v46 }
 0x26e   :  { %v694_v52 = vpop.f32.mrf.mxu3  ;;  %v830_v11 = vor.u32 1.1754944e-38, %v829_v2  ;;  %vm828_vm11 = vcmp.eq.f32.partialorder %v827_v5, 8.507059e+37 }
 0x26f   :  { %v806_v53 = vmul.f32 %v1294_v44, %v805_v50  ;;  %v695_v55 = vadd.f32 %v1596_v19, %v694_v52 }
 0x271   :  { %v1296_v56 = vpop.eup %1295  ;;  %v807_v57 = vadd.f32 %v1294_v44, %v806_v53  ;;  %v1226_v58 = vmul.f32 -1.442695, %v695_v55 }
 0x272   :  { %v1298_v59 = vpop.eup %1297  ;;  %v775_v61 = vadd.f32 1.0, %v1296_v56 }
 0x273   :  { %v811_v62 = vsel %vm810_vm6, %v1294_v44, %v807_v57  ;;  %v819_v63 = vmul.f32 %v1298_v59, %v774_v46  ;;  %1299 = vpow2.f32 %v1226_v58  ;;  %vm824_vm8 = vweird.f32 %v1298_v59 }
 0x274   :  { %v816_v0 = vsel %vm813_vm7, %v815_v60, %v811_v62  ;;  %1301 = vrcp.f32 %v775_v61  ;;  %vm825_vm10 = vmor %vm823_vm9, %vm824_vm8  ;;  %v844_v17 = vand.u32 2147483648, %v775_v61  ;;  %v842_v21 = vand.u32 2147483647, %v775_v61 }
 0x275   :  { %1029 = vst [vmem:[#allocation3 + $0x8] sm:$0xff] %v816_v0  ;;  %v820_v1 = vsub.f32 1.0, %v819_v63  ;;  %vm838_vm13 = vweird.f32 %v775_v61 }
 0x276   :  { %v696_v3 = vpop.f32.mrf.mxu3  ;;  %v845_v29 = vor.u32 1.1754944e-38, %v844_v17  ;;  %vm843_vm15 = vcmp.eq.f32.partialorder %v842_v21, 8.507059e+37 }
 0x277   :  { %v821_v4 = vmul.f32 %v1298_v59, %v820_v1  ;;  %v697_v6 = vadd.f32 %v1596_v19, %v696_v3 }
 0x279   :  { %v1300_v7 = vpop.eup %1299  ;;  %v822_v8 = vadd.f32 %v1298_v59, %v821_v4  ;;  %v1227_v9 = vmul.f32 -1.442695, %v697_v6 }
 0x27a   :  { %v1302_v10 = vpop.eup %1301  ;;  %v776_v12 = vadd.f32 1.0, %v1300_v7 }
 0x27b   :  { %v826_v13 = vsel %vm825_vm10, %v1298_v59, %v822_v8  ;;  %v834_v14 = vmul.f32 %v1302_v10, %v775_v61  ;;  %1303 = vpow2.f32 %v1227_v9  ;;  %vm839_vm12 = vweird.f32 %v1302_v10 }
 0x27c   :  { %v831_v15 = vsel %vm828_vm11, %v830_v11, %v826_v13  ;;  %1305 = vrcp.f32 %v776_v12  ;;  %vm840_vm14 = vmor %vm838_vm13, %vm839_vm12  ;;  %v859_v25 = vand.u32 2147483648, %v776_v12  ;;  %v857_v36 = vand.u32 2147483647, %v776_v12 }
 0x27d   :  { %1030 = vst [vmem:[#allocation3 + $0x10] sm:$0xff] %v831_v15  ;;  %v835_v16 = vsub.f32 1.0, %v834_v14  ;;  %vm853_vm1 = vweird.f32 %v776_v12 }
 0x27e   :  { %v699_v18 = vpop.f32.mrf.mxu3  ;;  %v860_v42 = vor.u32 1.1754944e-38, %v859_v25  ;;  %vm858_vm3 = vcmp.eq.f32.partialorder %v857_v36, 8.507059e+37 }
 0x27f   :  { %v836_v20 = vmul.f32 %v1302_v10, %v835_v16  ;;  %v700_v22 = vadd.f32 %v1596_v19, %v699_v18 }
 0x281   :  { %v1304_v23 = vpop.eup %1303  ;;  %v837_v24 = vadd.f32 %v1302_v10, %v836_v20  ;;  %v1228_v26 = vmul.f32 -1.442695, %v700_v22 }
 0x282   :  { %v1306_v28 = vpop.eup %1305  ;;  %v777_v30 = vadd.f32 1.0, %v1304_v23 }
 0x283   :  { %v841_v31 = vsel %vm840_vm14, %v1302_v10, %v837_v24  ;;  %v849_v32 = vmul.f32 %v1306_v28, %v776_v12  ;;  %1307 = vpow2.f32 %v1228_v26  ;;  %vm854_vm0 = vweird.f32 %v1306_v28 }
 0x284   :  { %v846_v33 = vsel %vm843_vm15, %v845_v29, %v841_v31  ;;  %1309 = vrcp.f32 %v777_v30  ;;  %vm855_vm2 = vmor %vm853_vm1, %vm854_vm0  ;;  %v874_v48 = vand.u32 2147483648, %v777_v30  ;;  %v872_v51 = vand.u32 2147483647, %v777_v30 }
 0x285   :  { %1031 = vst [vmem:[#allocation3 + $0x18] sm:$0xff] %v846_v33  ;;  %v850_v27 = vsub.f32 1.0, %v849_v32  ;;  %vm868_vm5 = vweird.f32 %v777_v30 }
 0x286   :  { %v701_v34 = vpop.f32.mrf.mxu3  ;;  %v875_v57 = vor.u32 1.1754944e-38, %v874_v48  ;;  %vm873_vm7 = vcmp.eq.f32.partialorder %v872_v51, 8.507059e+37 }
 0x287   :  { %v851_v35 = vmul.f32 %v1306_v28, %v850_v27  ;;  %v702_v37 = vadd.f32 %v1596_v19, %v701_v34 }
 0x289   :  { %v1308_v38 = vpop.eup %1307  ;;  %v852_v39 = vadd.f32 %v1306_v28, %v851_v35  ;;  %v1229_v40 = vmul.f32 -1.442695, %v702_v37 }
 0x28a   :  { %v1310_v41 = vpop.eup %1309  ;;  %v778_v43 = vadd.f32 1.0, %v1308_v38 }
 0x28b   :  { %v856_v44 = vsel %vm855_vm2, %v1306_v28, %v852_v39  ;;  %v864_v45 = vmul.f32 %v1310_v41, %v777_v30  ;;  %1311 = vpow2.f32 %v1229_v40  ;;  %vm869_vm4 = vweird.f32 %v1310_v41 }
 0x28c   :  { %v861_v46 = vsel %vm858_vm3, %v860_v42, %v856_v44  ;;  %1313 = vrcp.f32 %v778_v43  ;;  %vm870_vm6 = vmor %vm868_vm5, %vm869_vm4  ;;  %v889_v63 = vand.u32 2147483648, %v778_v43  ;;  %v887_v2 = vand.u32 2147483647, %v778_v43 }
 0x28d   :  { %1032 = vst [vmem:[#allocation3 + $0x20] sm:$0xff] %v861_v46  ;;  %v865_v47 = vsub.f32 1.0, %v864_v45  ;;  %vm883_vm9 = vweird.f32 %v778_v43 }
 0x28e   :  { %v704_v49 = vpop.f32.mrf.mxu3  ;;  %v890_v8 = vor.u32 1.1754944e-38, %v889_v63  ;;  %vm888_vm11 = vcmp.eq.f32.partialorder %v887_v2, 8.507059e+37 }
 0x28f   :  { %v866_v50 = vmul.f32 %v1310_v41, %v865_v47  ;;  %v705_v52 = vadd.f32 %v1596_v19, %v704_v49 }
 0x291   :  { %v1312_v53 = vpop.eup %1311  ;;  %v867_v54 = vadd.f32 %v1310_v41, %v866_v50  ;;  %v1230_v55 = vmul.f32 -1.442695, %v705_v52 }
 0x292   :  { %v1314_v56 = vpop.eup %1313  ;;  %v779_v58 = vadd.f32 1.0, %v1312_v53 }
 0x293   :  { %v871_v59 = vsel %vm870_vm6, %v1310_v41, %v867_v54  ;;  %v879_v60 = vmul.f32 %v1314_v56, %v778_v43  ;;  %1315 = vpow2.f32 %v1230_v55  ;;  %vm884_vm8 = vweird.f32 %v1314_v56 }
 0x294   :  { %v876_v61 = vsel %vm873_vm7, %v875_v57, %v871_v59  ;;  %1317 = vrcp.f32 %v779_v58  ;;  %vm885_vm10 = vmor %vm883_vm9, %vm884_vm8  ;;  %v904_v14 = vand.u32 2147483648, %v779_v58  ;;  %v902_v17 = vand.u32 2147483647, %v779_v58 }
 0x295   :  { %1033 = vst [vmem:[#allocation3 + $0x28] sm:$0xff] %v876_v61  ;;  %v880_v62 = vsub.f32 1.0, %v879_v60  ;;  %vm898_vm13 = vweird.f32 %v779_v58 }
 0x296   :  { %v706_v0 = vpop.f32.mrf.mxu3  ;;  %v905_v24 = vor.u32 1.1754944e-38, %v904_v14  ;;  %vm903_vm15 = vcmp.eq.f32.partialorder %v902_v17, 8.507059e+37 }
 0x297   :  { %v881_v1 = vmul.f32 %v1314_v56, %v880_v62  ;;  %v707_v3 = vadd.f32 %v1596_v19, %v706_v0 }
 0x299   :  { %v1316_v4 = vpop.eup %1315  ;;  %v882_v5 = vadd.f32 %v1314_v56, %v881_v1  ;;  %v1231_v6 = vmul.f32 -1.442695, %v707_v3 }
 0x29a   :  { %v1318_v7 = vpop.eup %1317  ;;  %v780_v9 = vadd.f32 1.0, %v1316_v4 }
 0x29b   :  { %v886_v10 = vsel %vm885_vm10, %v1314_v56, %v882_v5  ;;  %v894_v11 = vmul.f32 %v1318_v7, %v779_v58  ;;  %1319 = vpow2.f32 %v1231_v6  ;;  %vm899_vm12 = vweird.f32 %v1318_v7 }
 0x29c   :  { %v891_v12 = vsel %vm888_vm11, %v890_v8, %v886_v10  ;;  %1321 = vrcp.f32 %v780_v9  ;;  %vm900_vm14 = vmor %vm898_vm13, %vm899_vm12  ;;  %v919_v32 = vand.u32 2147483648, %v780_v9  ;;  %v917_v25 = vand.u32 2147483647, %v780_v9 }
 0x29d   :  { %1034 = vst [vmem:[#allocation3 + $0x30] sm:$0xff] %v891_v12  ;;  %v895_v13 = vsub.f32 1.0, %v894_v11  ;;  %vm913_vm1 = vweird.f32 %v780_v9 }
 0x29e   :  { %v709_v15 = vpop.f32.mrf.mxu3  ;;  %v920_v39 = vor.u32 1.1754944e-38, %v919_v32  ;;  %vm918_vm3 = vcmp.eq.f32.partialorder %v917_v25, 8.507059e+37 }
 0x29f   :  { %v896_v16 = vmul.f32 %v1318_v7, %v895_v13  ;;  %v710_v18 = vadd.f32 %v1596_v19, %v709_v15 }
 0x2a1   :  { %v1320_v20 = vpop.eup %1319  ;;  %v897_v21 = vadd.f32 %v1318_v7, %v896_v16  ;;  %v1232_v22 = vmul.f32 -1.442695, %v710_v18 }
 0x2a2   :  { %v1322_v23 = vpop.eup %1321  ;;  %v781_v26 = vadd.f32 1.0, %v1320_v20 }
 0x2a3   :  { %v901_v28 = vsel %vm900_vm14, %v1318_v7, %v897_v21  ;;  %v909_v29 = vmul.f32 %v1322_v23, %v780_v9  ;;  %1323 = vpow2.f32 %v1232_v22  ;;  %vm914_vm0 = vweird.f32 %v1322_v23 }
 0x2a4   :  { %v906_v30 = vsel %vm903_vm15, %v905_v24, %v901_v28  ;;  %1325 = vrcp.f32 %v781_v26  ;;  %vm915_vm2 = vmor %vm913_vm1, %vm914_vm0  ;;  %v934_v45 = vand.u32 2147483648, %v781_v26  ;;  %v932_v48 = vand.u32 2147483647, %v781_v26 }
 0x2a5   :  { %1035 = vst [vmem:[#allocation3 + $0x38] sm:$0xff] %v906_v30  ;;  %v910_v31 = vsub.f32 1.0, %v909_v29  ;;  %vm928_vm5 = vweird.f32 %v781_v26 }
 0x2a6   :  { %v711_v33 = vpop.f32.mrf.mxu3  ;;  %v935_v54 = vor.u32 1.1754944e-38, %v934_v45  ;;  %vm933_vm7 = vcmp.eq.f32.partialorder %v932_v48, 8.507059e+37 }
 0x2a7   :  { %v911_v27 = vmul.f32 %v1322_v23, %v910_v31  ;;  %v712_v34 = vadd.f32 %v1596_v19, %v711_v33 }
 0x2a9   :  { %v1324_v35 = vpop.eup %1323  ;;  %v912_v36 = vadd.f32 %v1322_v23, %v911_v27  ;;  %v1233_v37 = vmul.f32 -1.442695, %v712_v34 }
 0x2aa   :  { %v1326_v38 = vpop.eup %1325  ;;  %v782_v40 = vadd.f32 1.0, %v1324_v35 }
 0x2ab   :  { %v916_v41 = vsel %vm915_vm2, %v1322_v23, %v912_v36  ;;  %v924_v42 = vmul.f32 %v1326_v38, %v781_v26  ;;  %1327 = vpow2.f32 %v1233_v37  ;;  %vm929_vm4 = vweird.f32 %v1326_v38 }
 0x2ac   :  { %v921_v43 = vsel %vm918_vm3, %v920_v39, %v916_v41  ;;  %1329 = vrcp.f32 %v782_v40  ;;  %vm930_vm6 = vmor %vm928_vm5, %vm929_vm4  ;;  %v949_v60 = vand.u32 2147483648, %v782_v40  ;;  %v947_v63 = vand.u32 2147483647, %v782_v40 }
 0x2ad   :  { %1036 = vst [vmem:[#allocation3 + $0x40] sm:$0xff] %v921_v43  ;;  %v925_v44 = vsub.f32 1.0, %v924_v42  ;;  %vm943_vm9 = vweird.f32 %v782_v40 }
 0x2ae   :  { %v714_v46 = vpop.f32.mrf.mxu3  ;;  %v950_v5 = vor.u32 1.1754944e-38, %v949_v60  ;;  %vm948_vm11 = vcmp.eq.f32.partialorder %v947_v63, 8.507059e+37 }
 0x2af   :  { %v926_v47 = vmul.f32 %v1326_v38, %v925_v44  ;;  %v715_v49 = vadd.f32 %v1596_v19, %v714_v46 }
 0x2b1   :  { %v1328_v50 = vpop.eup %1327  ;;  %v927_v51 = vadd.f32 %v1326_v38, %v926_v47  ;;  %v1234_v52 = vmul.f32 -1.442695, %v715_v49 }
 0x2b2   :  { %v1330_v53 = vpop.eup %1329  ;;  %v783_v55 = vadd.f32 1.0, %v1328_v50 }
 0x2b3   :  { %v931_v56 = vsel %vm930_vm6, %v1326_v38, %v927_v51  ;;  %v939_v57 = vmul.f32 %v1330_v53, %v782_v40  ;;  %1331 = vpow2.f32 %v1234_v52  ;;  %vm944_vm8 = vweird.f32 %v1330_v53 }
 0x2b4   :  { %v936_v58 = vsel %vm933_vm7, %v935_v54, %v931_v56  ;;  %1333 = vrcp.f32 %v783_v55  ;;  %vm945_vm10 = vmor %vm943_vm9, %vm944_vm8  ;;  %v964_v11 = vand.u32 2147483648, %v783_v55  ;;  %v962_v14 = vand.u32 2147483647, %v783_v55 }
 0x2b5   :  { %1037 = vst [vmem:[#allocation3 + $0x48] sm:$0xff] %v936_v58  ;;  %v940_v59 = vsub.f32 1.0, %v939_v57  ;;  %vm958_vm13 = vweird.f32 %v783_v55 }
 0x2b6   :  { %v716_v61 = vpop.f32.mrf.mxu3  ;;  %v965_v21 = vor.u32 1.1754944e-38, %v964_v11  ;;  %vm963_vm15 = vcmp.eq.f32.partialorder %v962_v14, 8.507059e+37 }
 0x2b7   :  { %v941_v62 = vmul.f32 %v1330_v53, %v940_v59  ;;  %v717_v0 = vadd.f32 %v1596_v19, %v716_v61 }
 0x2b9   :  { %v1332_v1 = vpop.eup %1331  ;;  %v942_v2 = vadd.f32 %v1330_v53, %v941_v62  ;;  %v1235_v3 = vmul.f32 -1.442695, %v717_v0 }
 0x2ba   :  { %v1334_v4 = vpop.eup %1333  ;;  %v784_v6 = vadd.f32 1.0, %v1332_v1 }
 0x2bb   :  { %v946_v7 = vsel %vm945_vm10, %v1330_v53, %v942_v2  ;;  %v954_v8 = vmul.f32 %v1334_v4, %v783_v55  ;;  %1335 = vpow2.f32 %v1235_v3  ;;  %vm959_vm12 = vweird.f32 %v1334_v4 }
 0x2bc   :  { %v951_v9 = vsel %vm948_vm11, %v950_v5, %v946_v7  ;;  %1337 = vrcp.f32 %v784_v6  ;;  %vm960_vm14 = vmor %vm958_vm13, %vm959_vm12  ;;  %v979_v29 = vand.u32 2147483648, %v784_v6  ;;  %v977_v32 = vand.u32 2147483647, %v784_v6 }
 0x2bd   :  { %1038 = vst [vmem:[#allocation3 + $0x50] sm:$0xff] %v951_v9  ;;  %v955_v10 = vsub.f32 1.0, %v954_v8  ;;  %vm973_vm1 = vweird.f32 %v784_v6 }
 0x2be   :  { %v719_v12 = vpop.f32.mrf.mxu3  ;;  %v980_v36 = vor.u32 1.1754944e-38, %v979_v29  ;;  %vm978_vm3 = vcmp.eq.f32.partialorder %v977_v32, 8.507059e+37 }
 0x2bf   :  { %v956_v13 = vmul.f32 %v1334_v4, %v955_v10  ;;  %v720_v15 = vadd.f32 %v1596_v19, %v719_v12 }
 0x2c1   :  { %v1336_v16 = vpop.eup %1335  ;;  %v957_v17 = vadd.f32 %v1334_v4, %v956_v13  ;;  %v1236_v18 = vmul.f32 -1.442695, %v720_v15 }
 0x2c2   :  { %v1338_v20 = vpop.eup %1337  ;;  %v785_v22 = vadd.f32 1.0, %v1336_v16 }
 0x2c3   :  { %v961_v23 = vsel %vm960_vm14, %v1334_v4, %v957_v17  ;;  %v969_v24 = vmul.f32 %v1338_v20, %v784_v6  ;;  %1339 = vpow2.f32 %v1236_v18  ;;  %vm974_vm0 = vweird.f32 %v1338_v20 }
 0x2c4   :  { %v966_v26 = vsel %vm963_vm15, %v965_v21, %v961_v23  ;;  %1341 = vrcp.f32 %v785_v22  ;;  %vm975_vm2 = vmor %vm973_vm1, %vm974_vm0  ;;  %v994_v42 = vand.u32 2147483648, %v785_v22  ;;  %vm988_vm5 = vweird.f32 %v785_v22 }
 0x2c5   :  { %1039 = vst [vmem:[#allocation3 + $0x58] sm:$0xff] %v966_v26  ;;  %v970_v28 = vsub.f32 1.0, %v969_v24 }
 0x2c6   :  { %v721_v30 = vpop.f32.mrf.mxu3  ;;  %v995_v47 = vor.u32 1.1754944e-38, %v994_v42 }
 0x2c7   :  { %v971_v31 = vmul.f32 %v1338_v20, %v970_v28  ;;  %v722_v33 = vadd.f32 %v1596_v19, %v721_v30  ;;  %v992_v19 = vand.u32 2147483647, %v785_v22 }
 0x2c9   :  { %v1340_v27 = vpop.eup %1339  ;;  %v972_v25 = vadd.f32 %v1338_v20, %v971_v31  ;;  %v1237_v34 = vmul.f32 -1.442695, %v722_v33  ;;  %vm993_vm7 = vcmp.eq.f32.partialorder %v992_v19, 8.507059e+37 }
 0x2ca   :  { %v1342_v35 = vpop.eup %1341  ;;  %v786_v37 = vadd.f32 1.0, %v1340_v27 }
 0x2cb   :  { %v976_v38 = vsel %vm975_vm2, %v1338_v20, %v972_v25  ;;  %v984_v39 = vmul.f32 %v1342_v35, %v785_v22  ;;  %1343 = vpow2.f32 %v1237_v34  ;;  %vm989_vm4 = vweird.f32 %v1342_v35 }
 0x2cc   :  { %v981_v40 = vsel %vm978_vm3, %v980_v36, %v976_v38  ;;  %1345 = vrcp.f32 %v786_v37  ;;  %vm990_vm6 = vmor %vm988_vm5, %vm989_vm4  ;;  %v1009_v53 = vand.u32 2147483648, %v786_v37  ;;  %v1007_v55 = vand.u32 2147483647, %v786_v37 }
 0x2cd   :  { %1040 = vst [vmem:[#allocation3 + $0x60] sm:$0xff] %v981_v40  ;;  %v985_v41 = vsub.f32 1.0, %v984_v39  ;;  %vm1003_vm9 = vweird.f32 %v786_v37 }
 0x2ce   :  { %v1010_v58 = vor.u32 1.1754944e-38, %v1009_v53  ;;  %vm1008_vm11 = vcmp.eq.f32.partialorder %v1007_v55, 8.507059e+37 }
 0x2cf   :  { %v986_v43 = vmul.f32 %v1342_v35, %v985_v41 }
 0x2d1   :  { %v1344_v44 = vpop.eup %1343  ;;  %v987_v45 = vadd.f32 %v1342_v35, %v986_v43 }
 0x2d2   :  { %v1346_v46 = vpop.eup %1345  ;;  %v787_v48 = vadd.f32 1.0, %v1344_v44 }
 0x2d3   :  { %v991_v49 = vsel %vm990_vm6, %v1342_v35, %v987_v45  ;;  %v999_v50 = vmul.f32 %v1346_v46, %v786_v37  ;;  %vm1004_vm8 = vweird.f32 %v1346_v46 }
 0x2d4   :  { %v996_v51 = vsel %vm993_vm7, %v995_v47, %v991_v49  ;;  %1347 = vrcp.f32 %v787_v48  ;;  %vm1005_vm10 = vmor %vm1003_vm9, %vm1004_vm8  ;;  %v1024_v63 = vand.u32 2147483648, %v787_v48  ;;  %v1022_v1 = vand.u32 2147483647, %v787_v48 }
 0x2d5   :  { %1041 = vst [vmem:[#allocation3 + $0x68] sm:$0xff] %v996_v51  ;;  %v1000_v52 = vsub.f32 1.0, %v999_v50  ;;  %vm1018_vm13 = vweird.f32 %v787_v48 }
 0x2d6   :  { %v1025_v3 = vor.u32 1.1754944e-38, %v1024_v63  ;;  %vm1023_vm15 = vcmp.eq.f32.partialorder %v1022_v1, 8.507059e+37 }
 0x2d7   :  { %v1001_v54 = vmul.f32 %v1346_v46, %v1000_v52 }
 0x2d9   :  { %v1002_v56 = vadd.f32 %v1346_v46, %v1001_v54 }
 0x2da   :  { %v1348_v57 = vpop.eup %1347 }
 0x2db   :  { %v1006_v59 = vsel %vm1005_vm10, %v1346_v46, %v1002_v56  ;;  %v1014_v60 = vmul.f32 %v1348_v57, %v787_v48  ;;  %vm1019_vm12 = vweird.f32 %v1348_v57 }
 0x2dc   :  { %v1011_v61 = vsel %vm1008_vm11, %v1010_v58, %v1006_v59  ;;  %vm1020_vm14 = vmor %vm1018_vm13, %vm1019_vm12 }
 0x2dd   :  { %1042 = vst [vmem:[#allocation3 + $0x70] sm:$0xff] %v1011_v61  ;;  %v1015_v62 = vsub.f32 1.0, %v1014_v60 }
 0x2df   :  { %v1016_v0 = vmul.f32 %v1348_v57, %v1015_v62 }
 0x2e1   :  { %v1017_v2 = vadd.f32 %v1348_v57, %v1016_v0 }
 0x2e3   :  { %v1021_v4 = vsel %vm1020_vm14, %v1348_v57, %v1017_v2 }
 0x2e4   :  { %v1026_v5 = vsel %vm1023_vm15, %v1025_v3, %v1021_v4 }
 0x2e5   :  { %1043 = vst [vmem:[#allocation3 + $0x78] sm:$0xff] %v1026_v5 }
 0x2e6   :  { %1056 = dma.vmem_to_hbm [thread:$0]  %s1049_s21, 2048, %s1051_s24, [#allocation4], %s1376_s25, %s1376_s25, %s1377_s26  }
 0x2e7   :  { %1373 = dma.done.wait [#allocation4], 2048  }
 0x2e8   :  { %1374 = vsyncadd [#allocation4], 4294965248 }
 0x2e9   :  { %1061 = vsyncpa [#allocation4], 1 }

</bundles_post_ra>
